<compile_context>
chip_gen: v7x
topology: tpu7x:2x2x1
jax: 0.10.0
libtpu: 0.0.40
codegen_flags: <defaults>
</compile_context>

<pallas_src>
import numpy as np
import jax
import jax.numpy as jnp
from jax import lax
from jax.experimental import pallas as pl
from jax.experimental.pallas import tpu as pltpu


def _round_up(x, m):
    return ((x + m - 1) // m) * m


def _pack_params(params, H, Hp, mxu_dtype):
    """Repack PyTorch-layout GRU weights into 128-lane-aligned per-gate blocks."""
    w_ih = jnp.asarray(params["w_ih"], jnp.float32)   # [3H, I], gate order r,z,n
    w_hh = jnp.asarray(params["w_hh"], jnp.float32)   # [3H, H]
    b_ih = jnp.asarray(params["b_ih"], jnp.float32)   # [3H]
    b_hh = jnp.asarray(params["b_hh"], jnp.float32)   # [3H]
    I = w_ih.shape[1]

    wih_p = jnp.zeros((I, 3 * Hp), jnp.float32)
    whh_p = jnp.zeros((Hp, 3 * Hp), jnp.float32)
    bih_p = jnp.zeros((1, 3 * Hp), jnp.float32)
    bhh_p = jnp.zeros((1, 3 * Hp), jnp.float32)
    for g in range(3):
        wih_p = wih_p.at[:, g * Hp:g * Hp + H].set(w_ih[g * H:(g + 1) * H, :].T)
        whh_p = whh_p.at[:H, g * Hp:g * Hp + H].set(w_hh[g * H:(g + 1) * H, :].T)
        bih_p = bih_p.at[0, g * Hp:g * Hp + H].set(b_ih[g * H:(g + 1) * H])
        bhh_p = bhh_p.at[0, g * Hp:g * Hp + H].set(b_hh[g * H:(g + 1) * H])
    # Zero padding keeps the padded hidden lanes exactly 0 through the GRU
    # update (h_pad' = 0.5 * h_pad = 0), so cropping back to H is exact.
    return (wih_p.astype(mxu_dtype), whh_p.astype(mxu_dtype), bih_p, bhh_p)


def encoder_forward(x, lengths, params, *, t_out, mxu_dtype=jnp.bfloat16,
                    batch_block=None):
    """Single-layer unidirectional GRU encoder (pack/unpack semantics).

    x:        [B, T, I] f32, batch_first (like the PyTorch module).
    lengths:  [B] int.
    t_out:    static time crop, == int(max(lengths)). Required (no host sync
              inside this wrapper -> it is safe to jit with traced lengths).
    mxu_dtype: dtype of MXU operands (x, W_ih, W_hh, GI). bfloat16 is valid on
              v5e/v6e/v7x; gate math and accumulation always stay f32.
    batch_block: sequences per grid step (rounded up to 8). Default
              min(128, round_up(B, 8)) so realistic batches fill MXU rows.
    Returns [B, t_out, H] f32.
    """
    B, T, I = x.shape
    H = params["w_hh"].shape[1]
    Hp = _round_up(H, 128)
    G = 3 * Hp

    if batch_block is None:
        batch_block = min(128, _round_up(B, 8))
    BB = _round_up(batch_block, 8)          # sublane-aligned batch block
    Bp = _round_up(B, BB)
    nb = Bp // BB
    TB = T * BB

    wih_p, whh_p, bih_p, bhh_p = _pack_params(params, H, Hp, mxu_dtype)

    # Pad batch to whole blocks. Padded rows get length 0 -> zero output rows
    # and a frozen zero carry, then get cropped away below.
    x_p = jnp.pad(x.astype(jnp.float32), ((0, Bp - B), (0, 0), (0, 0)))
    # Block-major, time-major-within-block rows: row = t*BB + b_local.
    x2d = (x_p.reshape(nb, BB, T, I)
               .transpose(0, 2, 1, 3)
               .reshape(nb * TB, I)
               .astype(mxu_dtype))
    len_p = jnp.pad(lengths.astype(jnp.int32), (0, Bp - B)).reshape(Bp, 1)

    def kernel(x_ref, wih_ref, whh_ref, bih_ref, bhh_ref, len_ref,
               out_ref, gi_scr):
        # ---- Phase 1: one MXU matmul for ALL timesteps of this batch block.
        # (b_ih is added per-step in f32 so the bf16 GI store stays unbiased.)
        gi_scr[...] = jnp.dot(
            x_ref[...], wih_ref[...],
            preferred_element_type=jnp.float32).astype(gi_scr.dtype)

        # ---- Hoisted loop invariants (JAX does not CSE these inside loops).
        whh = whh_ref[...]                                      # [Hp, 3Hp]
        bih = jnp.broadcast_to(bih_ref[...], (BB, G))           # [BB, 3Hp] f32
        bhh = jnp.broadcast_to(bhh_ref[...], (BB, G))           # [BB, 3Hp] f32
        lens = len_ref[...]                                     # [BB, 1]  i32

        # ---- Phase 2: recurrence. Hidden state lives in the loop carry
        # (vregs): no VMEM round-trip on the serial critical path.
        def step(t, h_prev):
            row = pl.multiple_of(t * BB, BB)                    # sublane-aligned
            gi = gi_scr[pl.ds(row, BB), :].astype(jnp.float32) + bih
            gh = jnp.dot(h_prev.astype(mxu_dtype), whh,
                         preferred_element_type=jnp.float32) + bhh

            # Gate slices fall on 128-lane tile boundaries -> no XLU shuffles.
            r = jax.nn.sigmoid(gi[:, :Hp] + gh[:, :Hp])
            z = jax.nn.sigmoid(gi[:, Hp:2 * Hp] + gh[:, Hp:2 * Hp])
            n = jnp.tanh(gi[:, 2 * Hp:] + r * gh[:, 2 * Hp:])
            h_new = (1.0 - z) * n + z * h_prev                  # [BB, Hp] f32

            mask = t < lens                                     # [BB,1] -> bcast Hp
            # Full-tile, unmasked store (row multiple of 8, Hp multiple of 128).
            out_ref[pl.ds(row, BB), :] = jnp.where(mask, h_new, 0.0)
            return jnp.where(mask, h_new, h_prev)               # freeze past length

        h0 = jnp.zeros((BB, Hp), jnp.float32)
        # Full unroll gives the scheduler cross-iteration visibility (next
        # step's Whh matmul overlaps this step's gate math). Cap for huge T.
        lax.fori_loop(0, T, step, h0, unroll=True if T <= 64 else 8)

    out2d = pl.pallas_call(
        kernel,
        out_shape=jax.ShapeDtypeStruct((nb * TB, Hp), jnp.float32),
        grid=(nb,),
        in_specs=[
            pl.BlockSpec((TB, I), lambda i: (i, 0)),    # x rows of batch block i
            pl.BlockSpec((I, G), lambda i: (0, 0)),     # W_ih (VMEM-resident)
            pl.BlockSpec((Hp, G), lambda i: (0, 0)),    # W_hh (VMEM-resident)
            pl.BlockSpec((1, G), lambda i: (0, 0)),     # b_ih
            pl.BlockSpec((1, G), lambda i: (0, 0)),     # b_hh
            pl.BlockSpec((BB, 1), lambda i: (i, 0)),    # lengths of block i
        ],
        out_specs=pl.BlockSpec((TB, Hp), lambda i: (i, 0)),
        scratch_shapes=[pltpu.VMEM((TB, G), mxu_dtype)],        # GI scratch
        compiler_params=pltpu.CompilerParams(
            dimension_semantics=("parallel",),          # megacore batch sharding
            vmem_limit_bytes=32 * 1024 * 1024,          # safe on v5e/v6e/v7x
        ),
    )(x2d, wih_p, whh_p, bih_p, bhh_p, len_p)

    # Crop padded hidden lanes BEFORE the layout change (move H, not Hp, cols).
    out = out2d.reshape(nb, T, BB, Hp)[:, :, :, :H]
    out = out.transpose(0, 2, 1, 3).reshape(Bp, T, H)
    # TODO(synk): at scale, let consumers accept the kernel-native block/time
    #             major layout (or write [B, T, Hp] in-kernel) to avoid this
    #             HBM round-trip transpose.
    return out[:B, :t_out, :]


def gru_reference(x, lengths, params):
    """Host (numpy) reference mirroring torch.nn.GRU + pack/unpack semantics."""
    x = np.asarray(x, np.float64)
    lengths = np.asarray(lengths)
    w_ih = np.asarray(params["w_ih"], np.float64)
    w_hh = np.asarray(params["w_hh"], np.float64)
    b_ih = np.asarray(params["b_ih"], np.float64)
    b_hh = np.asarray(params["b_hh"], np.float64)
    B, T, _ = x.shape
    H = w_hh.shape[1]

    def sigmoid(v):
        return 1.0 / (1.0 + np.exp(-v))

    h = np.zeros((B, H))
    outs = np.zeros((B, T, H))
    for t in range(T):
        gi = x[:, t, :] @ w_ih.T + b_ih
        gh = h @ w_hh.T + b_hh
        r = sigmoid(gi[:, :H] + gh[:, :H])
        z = sigmoid(gi[:, H:2 * H] + gh[:, H:2 * H])
        n = np.tanh(gi[:, 2 * H:] + r * gh[:, 2 * H:])
        h_new = (1.0 - z) * n + z * h
        mask = (t < lengths)[:, None]
        h = np.where(mask, h_new, h)
        outs[:, t, :] = np.where(mask, h_new, 0.0)
    return outs[:, :int(lengths.max()), :]


if __name__ == "__main__":
    # Module hyper-params (small, consistent with the forward pass)
    input_size, hidden_size = 8, 32
    B, T = 2, 8

    key = jax.random.PRNGKey(0)
    k_x, k_wih, k_whh, k_bih, k_bhh = jax.random.split(key, 5)

    # Deterministic PyTorch-style uniform(-1/sqrt(H), 1/sqrt(H)) init.
    s = 1.0 / np.sqrt(hidden_size)
    params = {
        "w_ih": jax.random.uniform(k_wih, (3 * hidden_size, input_size), jnp.float32, -s, s),
        "w_hh": jax.random.uniform(k_whh, (3 * hidden_size, hidden_size), jnp.float32, -s, s),
        "b_ih": jax.random.uniform(k_bih, (3 * hidden_size,), jnp.float32, -s, s),
        "b_hh": jax.random.uniform(k_bhh, (3 * hidden_size,), jnp.float32, -s, s),
    }

    x = jax.random.normal(k_x, (B, T, input_size), jnp.float32)   # [B, T, I]
    lengths_np = np.array([8, 5], dtype=np.int32)                 # [B]
    lengths = jnp.asarray(lengths_np)
    t_out = int(lengths_np.max())   # static crop (pack/unpack pads to max length)

    ref = gru_reference(x, lengths_np, params)

    # f32 MXU operands: near-exact match to the reference.
    out_f32 = jax.block_until_ready(
        encoder_forward(x, lengths, params, t_out=t_out, mxu_dtype=jnp.float32))
    assert out_f32.shape == ref.shape, (out_f32.shape, ref.shape)
    np.testing.assert_allclose(np.asarray(out_f32), ref, atol=1e-4, rtol=1e-4)

    # Default path: bf16 MXU operands + bf16 GI scratch (valid on v5e/v6e/v7x;
    # gate math and accumulation stay f32). Tolerance reflects bf16 rounding of
    # GI and the per-step carry over T=8 steps.
    out_bf16 = jax.block_until_ready(
        encoder_forward(x, lengths, params, t_out=t_out))
    assert out_bf16.shape == ref.shape, (out_bf16.shape, ref.shape)
    np.testing.assert_allclose(np.asarray(out_bf16), ref, atol=8e-2, rtol=8e-2)

    print("KERNEL_OK")
</pallas_src>

<mosaic_0001>
module attributes {stable_mosaic.version = 11 : i64} {
  func.func @kernel(%arg0: i32, %arg1: memref<64x8xf32, #tpu.memory_space<vmem>>, %arg2: memref<8x384xf32, #tpu.memory_space<vmem>>, %arg3: memref<128x384xf32, #tpu.memory_space<vmem>>, %arg4: memref<1x384xf32, #tpu.memory_space<vmem>>, %arg5: memref<1x384xf32, #tpu.memory_space<vmem>>, %arg6: memref<8x1xi32, #tpu.memory_space<vmem>>, %arg7: memref<64x128xf32, #tpu.memory_space<vmem>>, %arg8: memref<64x384xf32, #tpu.memory_space<vmem>>) attributes {dimension_semantics = [#tpu.dimension_semantics<parallel>], iteration_bounds = array<i64: 1>, scalar_prefetch = 0 : i64, scratch_operands = 1 : i64, tpu.core_type = #tpu.core_type<tc>, window_params = [{transform_indices = @transform_0, window_bounds = array<i64: 64, 8>}, {pipeline_mode = #tpu.pipeline_mode<synchronous>, transform_indices = @transform_1, window_bounds = array<i64: 8, 384>}, {pipeline_mode = #tpu.pipeline_mode<synchronous>, transform_indices = @transform_2, window_bounds = array<i64: 128, 384>}, {pipeline_mode = #tpu.pipeline_mode<synchronous>, transform_indices = @transform_3, window_bounds = array<i64: 1, 384>}, {pipeline_mode = #tpu.pipeline_mode<synchronous>, transform_indices = @transform_4, window_bounds = array<i64: 1, 384>}, {transform_indices = @transform_5, window_bounds = array<i64: 8, 1>}, {transform_indices = @transform_6, window_bounds = array<i64: 64, 128>}]} {
    %c0 = arith.constant 0 : index
    %c0_0 = arith.constant 0 : index
    %0 = vector.load %arg1[%c0, %c0_0] : memref<64x8xf32, #tpu.memory_space<vmem>>, vector<64x8xf32>
    %c0_1 = arith.constant 0 : index
    %c0_2 = arith.constant 0 : index
    %1 = vector.load %arg2[%c0_1, %c0_2] : memref<8x384xf32, #tpu.memory_space<vmem>>, vector<8x384xf32>
    %cst = arith.constant dense<0.000000e+00> : vector<64x384xf32>
    %2 = tpu.matmul %0, %1, %cst {dimension_numbers = #tpu.dot_dimension_numbers<[1], [0], [0], [1], [0, 0, 1, 1], [], []>} : vector<64x8xf32>, vector<8x384xf32>, vector<64x384xf32> -> vector<64x384xf32>
    %c0_3 = arith.constant 0 : index
    %c0_4 = arith.constant 0 : index
    %3 = vector.load %arg8[%c0_3, %c0_4] : memref<64x384xf32, #tpu.memory_space<vmem>>, vector<64x384xf32>
    tpu.vector_store %arg8[%c0_3, %c0_4], %2 {strides = array<i32>} : memref<64x384xf32, #tpu.memory_space<vmem>>, vector<64x384xf32>,
    %c0_5 = arith.constant 0 : index
    %c0_6 = arith.constant 0 : index
    %4 = vector.load %arg3[%c0_5, %c0_6] : memref<128x384xf32, #tpu.memory_space<vmem>>, vector<128x384xf32>
    %c0_7 = arith.constant 0 : index
    %c0_8 = arith.constant 0 : index
    %5 = vector.load %arg4[%c0_7, %c0_8] : memref<1x384xf32, #tpu.memory_space<vmem>>, vector<1x384xf32>
    %6 = vector.shape_cast %5 : vector<1x384xf32> to vector<1x384xf32>
    %7 = vector.broadcast %6 : vector<1x384xf32> to vector<8x384xf32>
    %c0_9 = arith.constant 0 : index
    %c0_10 = arith.constant 0 : index
    %8 = vector.load %arg5[%c0_9, %c0_10] : memref<1x384xf32, #tpu.memory_space<vmem>>, vector<1x384xf32>
    %9 = vector.shape_cast %8 : vector<1x384xf32> to vector<1x384xf32>
    %10 = vector.broadcast %9 : vector<1x384xf32> to vector<8x384xf32>
    %c0_11 = arith.constant 0 : index
    %c0_12 = arith.constant 0 : index
    %11 = vector.load %arg6[%c0_11, %c0_12] : memref<8x1xi32, #tpu.memory_space<vmem>>, vector<8x1xi32>
    %cst_13 = arith.constant 0.000000e+00 : f32
    %12 = vector.broadcast %cst_13 : f32 to vector<8x128xf32>
    %c0_i32 = arith.constant 0 : i32
    %c8_i32 = arith.constant 8 : i32
    %13 = arith.muli %c0_i32, %c8_i32 : i32
    %14 = tpu.assume_multiple %13, 8 : i32
    %15 = arith.index_cast %14 : i32 to index
    %c0_14 = arith.constant 0 : index
    %16 = vector.load %arg8[%15, %c0_14] : memref<64x384xf32, #tpu.memory_space<vmem>>, vector<8x384xf32>
    %17 = arith.addf %16, %7 : vector<8x384xf32>
    %cst_15 = arith.constant dense<0.000000e+00> : vector<8x384xf32>
    %18 = tpu.matmul %12, %4, %cst_15 {dimension_numbers = #tpu.dot_dimension_numbers<[1], [0], [0], [1], [0, 0, 1, 1], [], []>} : vector<8x128xf32>, vector<128x384xf32>, vector<8x384xf32> -> vector<8x384xf32>
    %19 = arith.addf %18, %10 : vector<8x384xf32>
    %20 = vector.extract_strided_slice %17 {offsets = [0, 0], sizes = [8, 128], strides = [1, 1]} : vector<8x384xf32> to vector<8x128xf32>
    %21 = vector.extract_strided_slice %19 {offsets = [0, 0], sizes = [8, 128], strides = [1, 1]} : vector<8x384xf32> to vector<8x128xf32>
    %22 = arith.addf %20, %21 : vector<8x128xf32>
    %23 = arith.negf %22 : vector<8x128xf32>
    %24 = math.exp %23 : vector<8x128xf32>
    %cst_16 = arith.constant 1.000000e+00 : f32
    %25 = vector.broadcast %cst_16 : f32 to vector<8x128xf32>
    %26 = arith.addf %25, %24 : vector<8x128xf32>
    %27 = arith.divf %25, %26 : vector<8x128xf32>
    %28 = vector.extract_strided_slice %17 {offsets = [0, 128], sizes = [8, 128], strides = [1, 1]} : vector<8x384xf32> to vector<8x128xf32>
    %29 = vector.extract_strided_slice %19 {offsets = [0, 128], sizes = [8, 128], strides = [1, 1]} : vector<8x384xf32> to vector<8x128xf32>
    %30 = arith.addf %28, %29 : vector<8x128xf32>
    %31 = arith.negf %30 : vector<8x128xf32>
    %32 = math.exp %31 : vector<8x128xf32>
    %cst_17 = arith.constant 1.000000e+00 : f32
    %33 = vector.broadcast %cst_17 : f32 to vector<8x128xf32>
    %34 = arith.addf %33, %32 : vector<8x128xf32>
    %35 = arith.divf %33, %34 : vector<8x128xf32>
    %36 = vector.extract_strided_slice %17 {offsets = [0, 256], sizes = [8, 128], strides = [1, 1]} : vector<8x384xf32> to vector<8x128xf32>
    %37 = vector.extract_strided_slice %19 {offsets = [0, 256], sizes = [8, 128], strides = [1, 1]} : vector<8x384xf32> to vector<8x128xf32>
    %38 = arith.mulf %27, %37 : vector<8x128xf32>
    %39 = arith.addf %36, %38 : vector<8x128xf32>
    %40 = math.tanh %39 : vector<8x128xf32>
    %cst_18 = arith.constant 1.000000e+00 : f32
    %41 = vector.broadcast %cst_18 : f32 to vector<8x128xf32>
    %42 = arith.subf %41, %35 : vector<8x128xf32>
    %43 = arith.mulf %42, %40 : vector<8x128xf32>
    %44 = arith.mulf %35, %12 : vector<8x128xf32>
    %45 = arith.addf %43, %44 : vector<8x128xf32>
    %46 = vector.broadcast %c0_i32 : i32 to vector<8x1xi32>
    %47 = arith.cmpi slt, %46, %11 : vector<8x1xi32>
    %cst_19 = arith.constant 0.000000e+00 : f32
    %48 = vector.shape_cast %47 : vector<8x1xi1> to vector<8x1xi1>
    %49 = vector.broadcast %48 : vector<8x1xi1> to vector<8x128xi1>
    %50 = vector.broadcast %cst_19 : f32 to vector<8x128xf32>
    %51 = arith.select %49, %45, %50 : vector<8x128xi1>, vector<8x128xf32>
    %52 = arith.index_cast %14 : i32 to index
    %c0_20 = arith.constant 0 : index
    %53 = vector.load %arg7[%52, %c0_20] : memref<64x128xf32, #tpu.memory_space<vmem>>, vector<8x128xf32>
    tpu.vector_store %arg7[%52, %c0_20], %51 {strides = array<i32>} : memref<64x128xf32, #tpu.memory_space<vmem>>, vector<8x128xf32>,
    %54 = vector.shape_cast %47 : vector<8x1xi1> to vector<8x1xi1>
    %55 = vector.broadcast %54 : vector<8x1xi1> to vector<8x128xi1>
    %56 = arith.select %55, %45, %12 : vector<8x128xi1>, vector<8x128xf32>
    %c1_i32 = arith.constant 1 : i32
    %c8_i32_21 = arith.constant 8 : i32
    %57 = arith.muli %c1_i32, %c8_i32_21 : i32
    %58 = tpu.assume_multiple %57, 8 : i32
    %59 = arith.index_cast %58 : i32 to index
    %c0_22 = arith.constant 0 : index
    %60 = vector.load %arg8[%59, %c0_22] : memref<64x384xf32, #tpu.memory_space<vmem>>, vector<8x384xf32>
    %61 = arith.addf %60, %7 : vector<8x384xf32>
    %cst_23 = arith.constant dense<0.000000e+00> : vector<8x384xf32>
    %62 = tpu.matmul %56, %4, %cst_23 {dimension_numbers = #tpu.dot_dimension_numbers<[1], [0], [0], [1], [0, 0, 1, 1], [], []>} : vector<8x128xf32>, vector<128x384xf32>, vector<8x384xf32> -> vector<8x384xf32>
    %63 = arith.addf %62, %10 : vector<8x384xf32>
    %64 = vector.extract_strided_slice %61 {offsets = [0, 0], sizes = [8, 128], strides = [1, 1]} : vector<8x384xf32> to vector<8x128xf32>
    %65 = vector.extract_strided_slice %63 {offsets = [0, 0], sizes = [8, 128], strides = [1, 1]} : vector<8x384xf32> to vector<8x128xf32>
    %66 = arith.addf %64, %65 : vector<8x128xf32>
    %67 = arith.negf %66 : vector<8x128xf32>
    %68 = math.exp %67 : vector<8x128xf32>
    %cst_24 = arith.constant 1.000000e+00 : f32
    %69 = vector.broadcast %cst_24 : f32 to vector<8x128xf32>
    %70 = arith.addf %69, %68 : vector<8x128xf32>
    %71 = arith.divf %69, %70 : vector<8x128xf32>
    %72 = vector.extract_strided_slice %61 {offsets = [0, 128], sizes = [8, 128], strides = [1, 1]} : vector<8x384xf32> to vector<8x128xf32>
    %73 = vector.extract_strided_slice %63 {offsets = [0, 128], sizes = [8, 128], strides = [1, 1]} : vector<8x384xf32> to vector<8x128xf32>
    %74 = arith.addf %72, %73 : vector<8x128xf32>
    %75 = arith.negf %74 : vector<8x128xf32>
    %76 = math.exp %75 : vector<8x128xf32>
    %cst_25 = arith.constant 1.000000e+00 : f32
    %77 = vector.broadcast %cst_25 : f32 to vector<8x128xf32>
    %78 = arith.addf %77, %76 : vector<8x128xf32>
    %79 = arith.divf %77, %78 : vector<8x128xf32>
    %80 = vector.extract_strided_slice %61 {offsets = [0, 256], sizes = [8, 128], strides = [1, 1]} : vector<8x384xf32> to vector<8x128xf32>
    %81 = vector.extract_strided_slice %63 {offsets = [0, 256], sizes = [8, 128], strides = [1, 1]} : vector<8x384xf32> to vector<8x128xf32>
    %82 = arith.mulf %71, %81 : vector<8x128xf32>
    %83 = arith.addf %80, %82 : vector<8x128xf32>
    %84 = math.tanh %83 : vector<8x128xf32>
    %cst_26 = arith.constant 1.000000e+00 : f32
    %85 = vector.broadcast %cst_26 : f32 to vector<8x128xf32>
    %86 = arith.subf %85, %79 : vector<8x128xf32>
    %87 = arith.mulf %86, %84 : vector<8x128xf32>
    %88 = arith.mulf %79, %56 : vector<8x128xf32>
    %89 = arith.addf %87, %88 : vector<8x128xf32>
    %90 = vector.broadcast %c1_i32 : i32 to vector<8x1xi32>
    %91 = arith.cmpi slt, %90, %11 : vector<8x1xi32>
    %cst_27 = arith.constant 0.000000e+00 : f32
    %92 = vector.shape_cast %91 : vector<8x1xi1> to vector<8x1xi1>
    %93 = vector.broadcast %92 : vector<8x1xi1> to vector<8x128xi1>
    %94 = vector.broadcast %cst_27 : f32 to vector<8x128xf32>
    %95 = arith.select %93, %89, %94 : vector<8x128xi1>, vector<8x128xf32>
    %96 = arith.index_cast %58 : i32 to index
    %c0_28 = arith.constant 0 : index
    %97 = vector.load %arg7[%96, %c0_28] : memref<64x128xf32, #tpu.memory_space<vmem>>, vector<8x128xf32>
    tpu.vector_store %arg7[%96, %c0_28], %95 {strides = array<i32>} : memref<64x128xf32, #tpu.memory_space<vmem>>, vector<8x128xf32>,
    %98 = vector.shape_cast %91 : vector<8x1xi1> to vector<8x1xi1>
    %99 = vector.broadcast %98 : vector<8x1xi1> to vector<8x128xi1>
    %100 = arith.select %99, %89, %56 : vector<8x128xi1>, vector<8x128xf32>
    %c2_i32 = arith.constant 2 : i32
    %c8_i32_29 = arith.constant 8 : i32
    %101 = arith.muli %c2_i32, %c8_i32_29 : i32
    %102 = tpu.assume_multiple %101, 8 : i32
    %103 = arith.index_cast %102 : i32 to index
    %c0_30 = arith.constant 0 : index
    %104 = vector.load %arg8[%103, %c0_30] : memref<64x384xf32, #tpu.memory_space<vmem>>, vector<8x384xf32>
    %105 = arith.addf %104, %7 : vector<8x384xf32>
    %cst_31 = arith.constant dense<0.000000e+00> : vector<8x384xf32>
    %106 = tpu.matmul %100, %4, %cst_31 {dimension_numbers = #tpu.dot_dimension_numbers<[1], [0], [0], [1], [0, 0, 1, 1], [], []>} : vector<8x128xf32>, vector<128x384xf32>, vector<8x384xf32> -> vector<8x384xf32>
    %107 = arith.addf %106, %10 : vector<8x384xf32>
    %108 = vector.extract_strided_slice %105 {offsets = [0, 0], sizes = [8, 128], strides = [1, 1]} : vector<8x384xf32> to vector<8x128xf32>
    %109 = vector.extract_strided_slice %107 {offsets = [0, 0], sizes = [8, 128], strides = [1, 1]} : vector<8x384xf32> to vector<8x128xf32>
    %110 = arith.addf %108, %109 : vector<8x128xf32>
    %111 = arith.negf %110 : vector<8x128xf32>
    %112 = math.exp %111 : vector<8x128xf32>
    %cst_32 = arith.constant 1.000000e+00 : f32
    %113 = vector.broadcast %cst_32 : f32 to vector<8x128xf32>
    %114 = arith.addf %113, %112 : vector<8x128xf32>
    %115 = arith.divf %113, %114 : vector<8x128xf32>
    %116 = vector.extract_strided_slice %105 {offsets = [0, 128], sizes = [8, 128], strides = [1, 1]} : vector<8x384xf32> to vector<8x128xf32>
    %117 = vector.extract_strided_slice %107 {offsets = [0, 128], sizes = [8, 128], strides = [1, 1]} : vector<8x384xf32> to vector<8x128xf32>
    %118 = arith.addf %116, %117 : vector<8x128xf32>
    %119 = arith.negf %118 : vector<8x128xf32>
    %120 = math.exp %119 : vector<8x128xf32>
    %cst_33 = arith.constant 1.000000e+00 : f32
    %121 = vector.broadcast %cst_33 : f32 to vector<8x128xf32>
    %122 = arith.addf %121, %120 : vector<8x128xf32>
    %123 = arith.divf %121, %122 : vector<8x128xf32>
    %124 = vector.extract_strided_slice %105 {offsets = [0, 256], sizes = [8, 128], strides = [1, 1]} : vector<8x384xf32> to vector<8x128xf32>
    %125 = vector.extract_strided_slice %107 {offsets = [0, 256], sizes = [8, 128], strides = [1, 1]} : vector<8x384xf32> to vector<8x128xf32>
    %126 = arith.mulf %115, %125 : vector<8x128xf32>
    %127 = arith.addf %124, %126 : vector<8x128xf32>
    %128 = math.tanh %127 : vector<8x128xf32>
    %cst_34 = arith.constant 1.000000e+00 : f32
    %129 = vector.broadcast %cst_34 : f32 to vector<8x128xf32>
    %130 = arith.subf %129, %123 : vector<8x128xf32>
    %131 = arith.mulf %130, %128 : vector<8x128xf32>
    %132 = arith.mulf %123, %100 : vector<8x128xf32>
    %133 = arith.addf %131, %132 : vector<8x128xf32>
    %134 = vector.broadcast %c2_i32 : i32 to vector<8x1xi32>
    %135 = arith.cmpi slt, %134, %11 : vector<8x1xi32>
    %cst_35 = arith.constant 0.000000e+00 : f32
    %136 = vector.shape_cast %135 : vector<8x1xi1> to vector<8x1xi1>
    %137 = vector.broadcast %136 : vector<8x1xi1> to vector<8x128xi1>
    %138 = vector.broadcast %cst_35 : f32 to vector<8x128xf32>
    %139 = arith.select %137, %133, %138 : vector<8x128xi1>, vector<8x128xf32>
    %140 = arith.index_cast %102 : i32 to index
    %c0_36 = arith.constant 0 : index
    %141 = vector.load %arg7[%140, %c0_36] : memref<64x128xf32, #tpu.memory_space<vmem>>, vector<8x128xf32>
    tpu.vector_store %arg7[%140, %c0_36], %139 {strides = array<i32>} : memref<64x128xf32, #tpu.memory_space<vmem>>, vector<8x128xf32>,
    %142 = vector.shape_cast %135 : vector<8x1xi1> to vector<8x1xi1>
    %143 = vector.broadcast %142 : vector<8x1xi1> to vector<8x128xi1>
    %144 = arith.select %143, %133, %100 : vector<8x128xi1>, vector<8x128xf32>
    %c3_i32 = arith.constant 3 : i32
    %c8_i32_37 = arith.constant 8 : i32
    %145 = arith.muli %c3_i32, %c8_i32_37 : i32
    %146 = tpu.assume_multiple %145, 8 : i32
    %147 = arith.index_cast %146 : i32 to index
    %c0_38 = arith.constant 0 : index
    %148 = vector.load %arg8[%147, %c0_38] : memref<64x384xf32, #tpu.memory_space<vmem>>, vector<8x384xf32>
    %149 = arith.addf %148, %7 : vector<8x384xf32>
    %cst_39 = arith.constant dense<0.000000e+00> : vector<8x384xf32>
    %150 = tpu.matmul %144, %4, %cst_39 {dimension_numbers = #tpu.dot_dimension_numbers<[1], [0], [0], [1], [0, 0, 1, 1], [], []>} : vector<8x128xf32>, vector<128x384xf32>, vector<8x384xf32> -> vector<8x384xf32>
    %151 = arith.addf %150, %10 : vector<8x384xf32>
    %152 = vector.extract_strided_slice %149 {offsets = [0, 0], sizes = [8, 128], strides = [1, 1]} : vector<8x384xf32> to vector<8x128xf32>
    %153 = vector.extract_strided_slice %151 {offsets = [0, 0], sizes = [8, 128], strides = [1, 1]} : vector<8x384xf32> to vector<8x128xf32>
    %154 = arith.addf %152, %153 : vector<8x128xf32>
    %155 = arith.negf %154 : vector<8x128xf32>
    %156 = math.exp %155 : vector<8x128xf32>
    %cst_40 = arith.constant 1.000000e+00 : f32
    %157 = vector.broadcast %cst_40 : f32 to vector<8x128xf32>
    %158 = arith.addf %157, %156 : vector<8x128xf32>
    %159 = arith.divf %157, %158 : vector<8x128xf32>
    %160 = vector.extract_strided_slice %149 {offsets = [0, 128], sizes = [8, 128], strides = [1, 1]} : vector<8x384xf32> to vector<8x128xf32>
    %161 = vector.extract_strided_slice %151 {offsets = [0, 128], sizes = [8, 128], strides = [1, 1]} : vector<8x384xf32> to vector<8x128xf32>
    %162 = arith.addf %160, %161 : vector<8x128xf32>
    %163 = arith.negf %162 : vector<8x128xf32>
    %164 = math.exp %163 : vector<8x128xf32>
    %cst_41 = arith.constant 1.000000e+00 : f32
    %165 = vector.broadcast %cst_41 : f32 to vector<8x128xf32>
    %166 = arith.addf %165, %164 : vector<8x128xf32>
    %167 = arith.divf %165, %166 : vector<8x128xf32>
    %168 = vector.extract_strided_slice %149 {offsets = [0, 256], sizes = [8, 128], strides = [1, 1]} : vector<8x384xf32> to vector<8x128xf32>
    %169 = vector.extract_strided_slice %151 {offsets = [0, 256], sizes = [8, 128], strides = [1, 1]} : vector<8x384xf32> to vector<8x128xf32>
    %170 = arith.mulf %159, %169 : vector<8x128xf32>
    %171 = arith.addf %168, %170 : vector<8x128xf32>
    %172 = math.tanh %171 : vector<8x128xf32>
    %cst_42 = arith.constant 1.000000e+00 : f32
    %173 = vector.broadcast %cst_42 : f32 to vector<8x128xf32>
    %174 = arith.subf %173, %167 : vector<8x128xf32>
    %175 = arith.mulf %174, %172 : vector<8x128xf32>
    %176 = arith.mulf %167, %144 : vector<8x128xf32>
    %177 = arith.addf %175, %176 : vector<8x128xf32>
    %178 = vector.broadcast %c3_i32 : i32 to vector<8x1xi32>
    %179 = arith.cmpi slt, %178, %11 : vector<8x1xi32>
    %cst_43 = arith.constant 0.000000e+00 : f32
    %180 = vector.shape_cast %179 : vector<8x1xi1> to vector<8x1xi1>
    %181 = vector.broadcast %180 : vector<8x1xi1> to vector<8x128xi1>
    %182 = vector.broadcast %cst_43 : f32 to vector<8x128xf32>
    %183 = arith.select %181, %177, %182 : vector<8x128xi1>, vector<8x128xf32>
    %184 = arith.index_cast %146 : i32 to index
    %c0_44 = arith.constant 0 : index
    %185 = vector.load %arg7[%184, %c0_44] : memref<64x128xf32, #tpu.memory_space<vmem>>, vector<8x128xf32>
    tpu.vector_store %arg7[%184, %c0_44], %183 {strides = array<i32>} : memref<64x128xf32, #tpu.memory_space<vmem>>, vector<8x128xf32>,
    %186 = vector.shape_cast %179 : vector<8x1xi1> to vector<8x1xi1>
    %187 = vector.broadcast %186 : vector<8x1xi1> to vector<8x128xi1>
    %188 = arith.select %187, %177, %144 : vector<8x128xi1>, vector<8x128xf32>
    %c4_i32 = arith.constant 4 : i32
    %c8_i32_45 = arith.constant 8 : i32
    %189 = arith.muli %c4_i32, %c8_i32_45 : i32
    %190 = tpu.assume_multiple %189, 8 : i32
    %191 = arith.index_cast %190 : i32 to index
    %c0_46 = arith.constant 0 : index
    %192 = vector.load %arg8[%191, %c0_46] : memref<64x384xf32, #tpu.memory_space<vmem>>, vector<8x384xf32>
    %193 = arith.addf %192, %7 : vector<8x384xf32>
    %cst_47 = arith.constant dense<0.000000e+00> : vector<8x384xf32>
    %194 = tpu.matmul %188, %4, %cst_47 {dimension_numbers = #tpu.dot_dimension_numbers<[1], [0], [0], [1], [0, 0, 1, 1], [], []>} : vector<8x128xf32>, vector<128x384xf32>, vector<8x384xf32> -> vector<8x384xf32>
    %195 = arith.addf %194, %10 : vector<8x384xf32>
    %196 = vector.extract_strided_slice %193 {offsets = [0, 0], sizes = [8, 128], strides = [1, 1]} : vector<8x384xf32> to vector<8x128xf32>
    %197 = vector.extract_strided_slice %195 {offsets = [0, 0], sizes = [8, 128], strides = [1, 1]} : vector<8x384xf32> to vector<8x128xf32>
    %198 = arith.addf %196, %197 : vector<8x128xf32>
    %199 = arith.negf %198 : vector<8x128xf32>
    %200 = math.exp %199 : vector<8x128xf32>
    %cst_48 = arith.constant 1.000000e+00 : f32
    %201 = vector.broadcast %cst_48 : f32 to vector<8x128xf32>
    %202 = arith.addf %201, %200 : vector<8x128xf32>
    %203 = arith.divf %201, %202 : vector<8x128xf32>
    %204 = vector.extract_strided_slice %193 {offsets = [0, 128], sizes = [8, 128], strides = [1, 1]} : vector<8x384xf32> to vector<8x128xf32>
    %205 = vector.extract_strided_slice %195 {offsets = [0, 128], sizes = [8, 128], strides = [1, 1]} : vector<8x384xf32> to vector<8x128xf32>
    %206 = arith.addf %204, %205 : vector<8x128xf32>
    %207 = arith.negf %206 : vector<8x128xf32>
    %208 = math.exp %207 : vector<8x128xf32>
    %cst_49 = arith.constant 1.000000e+00 : f32
    %209 = vector.broadcast %cst_49 : f32 to vector<8x128xf32>
    %210 = arith.addf %209, %208 : vector<8x128xf32>
    %211 = arith.divf %209, %210 : vector<8x128xf32>
    %212 = vector.extract_strided_slice %193 {offsets = [0, 256], sizes = [8, 128], strides = [1, 1]} : vector<8x384xf32> to vector<8x128xf32>
    %213 = vector.extract_strided_slice %195 {offsets = [0, 256], sizes = [8, 128], strides = [1, 1]} : vector<8x384xf32> to vector<8x128xf32>
    %214 = arith.mulf %203, %213 : vector<8x128xf32>
    %215 = arith.addf %212, %214 : vector<8x128xf32>
    %216 = math.tanh %215 : vector<8x128xf32>
    %cst_50 = arith.constant 1.000000e+00 : f32
    %217 = vector.broadcast %cst_50 : f32 to vector<8x128xf32>
    %218 = arith.subf %217, %211 : vector<8x128xf32>
    %219 = arith.mulf %218, %216 : vector<8x128xf32>
    %220 = arith.mulf %211, %188 : vector<8x128xf32>
    %221 = arith.addf %219, %220 : vector<8x128xf32>
    %222 = vector.broadcast %c4_i32 : i32 to vector<8x1xi32>
    %223 = arith.cmpi slt, %222, %11 : vector<8x1xi32>
    %cst_51 = arith.constant 0.000000e+00 : f32
    %224 = vector.shape_cast %223 : vector<8x1xi1> to vector<8x1xi1>
    %225 = vector.broadcast %224 : vector<8x1xi1> to vector<8x128xi1>
    %226 = vector.broadcast %cst_51 : f32 to vector<8x128xf32>
    %227 = arith.select %225, %221, %226 : vector<8x128xi1>, vector<8x128xf32>
    %228 = arith.index_cast %190 : i32 to index
    %c0_52 = arith.constant 0 : index
    %229 = vector.load %arg7[%228, %c0_52] : memref<64x128xf32, #tpu.memory_space<vmem>>, vector<8x128xf32>
    tpu.vector_store %arg7[%228, %c0_52], %227 {strides = array<i32>} : memref<64x128xf32, #tpu.memory_space<vmem>>, vector<8x128xf32>,
    %230 = vector.shape_cast %223 : vector<8x1xi1> to vector<8x1xi1>
    %231 = vector.broadcast %230 : vector<8x1xi1> to vector<8x128xi1>
    %232 = arith.select %231, %221, %188 : vector<8x128xi1>, vector<8x128xf32>
    %c5_i32 = arith.constant 5 : i32
    %c8_i32_53 = arith.constant 8 : i32
    %233 = arith.muli %c5_i32, %c8_i32_53 : i32
    %234 = tpu.assume_multiple %233, 8 : i32
    %235 = arith.index_cast %234 : i32 to index
    %c0_54 = arith.constant 0 : index
    %236 = vector.load %arg8[%235, %c0_54] : memref<64x384xf32, #tpu.memory_space<vmem>>, vector<8x384xf32>
    %237 = arith.addf %236, %7 : vector<8x384xf32>
    %cst_55 = arith.constant dense<0.000000e+00> : vector<8x384xf32>
    %238 = tpu.matmul %232, %4, %cst_55 {dimension_numbers = #tpu.dot_dimension_numbers<[1], [0], [0], [1], [0, 0, 1, 1], [], []>} : vector<8x128xf32>, vector<128x384xf32>, vector<8x384xf32> -> vector<8x384xf32>
    %239 = arith.addf %238, %10 : vector<8x384xf32>
    %240 = vector.extract_strided_slice %237 {offsets = [0, 0], sizes = [8, 128], strides = [1, 1]} : vector<8x384xf32> to vector<8x128xf32>
    %241 = vector.extract_strided_slice %239 {offsets = [0, 0], sizes = [8, 128], strides = [1, 1]} : vector<8x384xf32> to vector<8x128xf32>
    %242 = arith.addf %240, %241 : vector<8x128xf32>
    %243 = arith.negf %242 : vector<8x128xf32>
    %244 = math.exp %243 : vector<8x128xf32>
    %cst_56 = arith.constant 1.000000e+00 : f32
    %245 = vector.broadcast %cst_56 : f32 to vector<8x128xf32>
    %246 = arith.addf %245, %244 : vector<8x128xf32>
    %247 = arith.divf %245, %246 : vector<8x128xf32>
    %248 = vector.extract_strided_slice %237 {offsets = [0, 128], sizes = [8, 128], strides = [1, 1]} : vector<8x384xf32> to vector<8x128xf32>
    %249 = vector.extract_strided_slice %239 {offsets = [0, 128], sizes = [8, 128], strides = [1, 1]} : vector<8x384xf32> to vector<8x128xf32>
    %250 = arith.addf %248, %249 : vector<8x128xf32>
    %251 = arith.negf %250 : vector<8x128xf32>
    %252 = math.exp %251 : vector<8x128xf32>
    %cst_57 = arith.constant 1.000000e+00 : f32
    %253 = vector.broadcast %cst_57 : f32 to vector<8x128xf32>
    %254 = arith.addf %253, %252 : vector<8x128xf32>
    %255 = arith.divf %253, %254 : vector<8x128xf32>
    %256 = vector.extract_strided_slice %237 {offsets = [0, 256], sizes = [8, 128], strides = [1, 1]} : vector<8x384xf32> to vector<8x128xf32>
    %257 = vector.extract_strided_slice %239 {offsets = [0, 256], sizes = [8, 128], strides = [1, 1]} : vector<8x384xf32> to vector<8x128xf32>
    %258 = arith.mulf %247, %257 : vector<8x128xf32>
    %259 = arith.addf %256, %258 : vector<8x128xf32>
    %260 = math.tanh %259 : vector<8x128xf32>
    %cst_58 = arith.constant 1.000000e+00 : f32
    %261 = vector.broadcast %cst_58 : f32 to vector<8x128xf32>
    %262 = arith.subf %261, %255 : vector<8x128xf32>
    %263 = arith.mulf %262, %260 : vector<8x128xf32>
    %264 = arith.mulf %255, %232 : vector<8x128xf32>
    %265 = arith.addf %263, %264 : vector<8x128xf32>
    %266 = vector.broadcast %c5_i32 : i32 to vector<8x1xi32>
    %267 = arith.cmpi slt, %266, %11 : vector<8x1xi32>
    %cst_59 = arith.constant 0.000000e+00 : f32
    %268 = vector.shape_cast %267 : vector<8x1xi1> to vector<8x1xi1>
    %269 = vector.broadcast %268 : vector<8x1xi1> to vector<8x128xi1>
    %270 = vector.broadcast %cst_59 : f32 to vector<8x128xf32>
    %271 = arith.select %269, %265, %270 : vector<8x128xi1>, vector<8x128xf32>
    %272 = arith.index_cast %234 : i32 to index
    %c0_60 = arith.constant 0 : index
    %273 = vector.load %arg7[%272, %c0_60] : memref<64x128xf32, #tpu.memory_space<vmem>>, vector<8x128xf32>
    tpu.vector_store %arg7[%272, %c0_60], %271 {strides = array<i32>} : memref<64x128xf32, #tpu.memory_space<vmem>>, vector<8x128xf32>,
    %274 = vector.shape_cast %267 : vector<8x1xi1> to vector<8x1xi1>
    %275 = vector.broadcast %274 : vector<8x1xi1> to vector<8x128xi1>
    %276 = arith.select %275, %265, %232 : vector<8x128xi1>, vector<8x128xf32>
    %c6_i32 = arith.constant 6 : i32
    %c8_i32_61 = arith.constant 8 : i32
    %277 = arith.muli %c6_i32, %c8_i32_61 : i32
    %278 = tpu.assume_multiple %277, 8 : i32
    %279 = arith.index_cast %278 : i32 to index
    %c0_62 = arith.constant 0 : index
    %280 = vector.load %arg8[%279, %c0_62] : memref<64x384xf32, #tpu.memory_space<vmem>>, vector<8x384xf32>
    %281 = arith.addf %280, %7 : vector<8x384xf32>
    %cst_63 = arith.constant dense<0.000000e+00> : vector<8x384xf32>
    %282 = tpu.matmul %276, %4, %cst_63 {dimension_numbers = #tpu.dot_dimension_numbers<[1], [0], [0], [1], [0, 0, 1, 1], [], []>} : vector<8x128xf32>, vector<128x384xf32>, vector<8x384xf32> -> vector<8x384xf32>
    %283 = arith.addf %282, %10 : vector<8x384xf32>
    %284 = vector.extract_strided_slice %281 {offsets = [0, 0], sizes = [8, 128], strides = [1, 1]} : vector<8x384xf32> to vector<8x128xf32>
    %285 = vector.extract_strided_slice %283 {offsets = [0, 0], sizes = [8, 128], strides = [1, 1]} : vector<8x384xf32> to vector<8x128xf32>
    %286 = arith.addf %284, %285 : vector<8x128xf32>
    %287 = arith.negf %286 : vector<8x128xf32>
    %288 = math.exp %287 : vector<8x128xf32>
    %cst_64 = arith.constant 1.000000e+00 : f32
    %289 = vector.broadcast %cst_64 : f32 to vector<8x128xf32>
    %290 = arith.addf %289, %288 : vector<8x128xf32>
    %291 = arith.divf %289, %290 : vector<8x128xf32>
    %292 = vector.extract_strided_slice %281 {offsets = [0, 128], sizes = [8, 128], strides = [1, 1]} : vector<8x384xf32> to vector<8x128xf32>
    %293 = vector.extract_strided_slice %283 {offsets = [0, 128], sizes = [8, 128], strides = [1, 1]} : vector<8x384xf32> to vector<8x128xf32>
    %294 = arith.addf %292, %293 : vector<8x128xf32>
    %295 = arith.negf %294 : vector<8x128xf32>
    %296 = math.exp %295 : vector<8x128xf32>
    %cst_65 = arith.constant 1.000000e+00 : f32
    %297 = vector.broadcast %cst_65 : f32 to vector<8x128xf32>
    %298 = arith.addf %297, %296 : vector<8x128xf32>
    %299 = arith.divf %297, %298 : vector<8x128xf32>
    %300 = vector.extract_strided_slice %281 {offsets = [0, 256], sizes = [8, 128], strides = [1, 1]} : vector<8x384xf32> to vector<8x128xf32>
    %301 = vector.extract_strided_slice %283 {offsets = [0, 256], sizes = [8, 128], strides = [1, 1]} : vector<8x384xf32> to vector<8x128xf32>
    %302 = arith.mulf %291, %301 : vector<8x128xf32>
    %303 = arith.addf %300, %302 : vector<8x128xf32>
    %304 = math.tanh %303 : vector<8x128xf32>
    %cst_66 = arith.constant 1.000000e+00 : f32
    %305 = vector.broadcast %cst_66 : f32 to vector<8x128xf32>
    %306 = arith.subf %305, %299 : vector<8x128xf32>
    %307 = arith.mulf %306, %304 : vector<8x128xf32>
    %308 = arith.mulf %299, %276 : vector<8x128xf32>
    %309 = arith.addf %307, %308 : vector<8x128xf32>
    %310 = vector.broadcast %c6_i32 : i32 to vector<8x1xi32>
    %311 = arith.cmpi slt, %310, %11 : vector<8x1xi32>
    %cst_67 = arith.constant 0.000000e+00 : f32
    %312 = vector.shape_cast %311 : vector<8x1xi1> to vector<8x1xi1>
    %313 = vector.broadcast %312 : vector<8x1xi1> to vector<8x128xi1>
    %314 = vector.broadcast %cst_67 : f32 to vector<8x128xf32>
    %315 = arith.select %313, %309, %314 : vector<8x128xi1>, vector<8x128xf32>
    %316 = arith.index_cast %278 : i32 to index
    %c0_68 = arith.constant 0 : index
    %317 = vector.load %arg7[%316, %c0_68] : memref<64x128xf32, #tpu.memory_space<vmem>>, vector<8x128xf32>
    tpu.vector_store %arg7[%316, %c0_68], %315 {strides = array<i32>} : memref<64x128xf32, #tpu.memory_space<vmem>>, vector<8x128xf32>,
    %318 = vector.shape_cast %311 : vector<8x1xi1> to vector<8x1xi1>
    %319 = vector.broadcast %318 : vector<8x1xi1> to vector<8x128xi1>
    %320 = arith.select %319, %309, %276 : vector<8x128xi1>, vector<8x128xf32>
    %c7_i32 = arith.constant 7 : i32
    %c8_i32_69 = arith.constant 8 : i32
    %321 = arith.muli %c7_i32, %c8_i32_69 : i32
    %322 = tpu.assume_multiple %321, 8 : i32
    %323 = arith.index_cast %322 : i32 to index
    %c0_70 = arith.constant 0 : index
    %324 = vector.load %arg8[%323, %c0_70] : memref<64x384xf32, #tpu.memory_space<vmem>>, vector<8x384xf32>
    %325 = arith.addf %324, %7 : vector<8x384xf32>
    %cst_71 = arith.constant dense<0.000000e+00> : vector<8x384xf32>
    %326 = tpu.matmul %320, %4, %cst_71 {dimension_numbers = #tpu.dot_dimension_numbers<[1], [0], [0], [1], [0, 0, 1, 1], [], []>} : vector<8x128xf32>, vector<128x384xf32>, vector<8x384xf32> -> vector<8x384xf32>
    %327 = arith.addf %326, %10 : vector<8x384xf32>
    %328 = vector.extract_strided_slice %325 {offsets = [0, 0], sizes = [8, 128], strides = [1, 1]} : vector<8x384xf32> to vector<8x128xf32>
    %329 = vector.extract_strided_slice %327 {offsets = [0, 0], sizes = [8, 128], strides = [1, 1]} : vector<8x384xf32> to vector<8x128xf32>
    %330 = arith.addf %328, %329 : vector<8x128xf32>
    %331 = arith.negf %330 : vector<8x128xf32>
    %332 = math.exp %331 : vector<8x128xf32>
    %cst_72 = arith.constant 1.000000e+00 : f32
    %333 = vector.broadcast %cst_72 : f32 to vector<8x128xf32>
    %334 = arith.addf %333, %332 : vector<8x128xf32>
    %335 = arith.divf %333, %334 : vector<8x128xf32>
    %336 = vector.extract_strided_slice %325 {offsets = [0, 128], sizes = [8, 128], strides = [1, 1]} : vector<8x384xf32> to vector<8x128xf32>
    %337 = vector.extract_strided_slice %327 {offsets = [0, 128], sizes = [8, 128], strides = [1, 1]} : vector<8x384xf32> to vector<8x128xf32>
    %338 = arith.addf %336, %337 : vector<8x128xf32>
    %339 = arith.negf %338 : vector<8x128xf32>
    %340 = math.exp %339 : vector<8x128xf32>
    %cst_73 = arith.constant 1.000000e+00 : f32
    %341 = vector.broadcast %cst_73 : f32 to vector<8x128xf32>
    %342 = arith.addf %341, %340 : vector<8x128xf32>
    %343 = arith.divf %341, %342 : vector<8x128xf32>
    %344 = vector.extract_strided_slice %325 {offsets = [0, 256], sizes = [8, 128], strides = [1, 1]} : vector<8x384xf32> to vector<8x128xf32>
    %345 = vector.extract_strided_slice %327 {offsets = [0, 256], sizes = [8, 128], strides = [1, 1]} : vector<8x384xf32> to vector<8x128xf32>
    %346 = arith.mulf %335, %345 : vector<8x128xf32>
    %347 = arith.addf %344, %346 : vector<8x128xf32>
    %348 = math.tanh %347 : vector<8x128xf32>
    %cst_74 = arith.constant 1.000000e+00 : f32
    %349 = vector.broadcast %cst_74 : f32 to vector<8x128xf32>
    %350 = arith.subf %349, %343 : vector<8x128xf32>
    %351 = arith.mulf %350, %348 : vector<8x128xf32>
    %352 = arith.mulf %343, %320 : vector<8x128xf32>
    %353 = arith.addf %351, %352 : vector<8x128xf32>
    %354 = vector.broadcast %c7_i32 : i32 to vector<8x1xi32>
    %355 = arith.cmpi slt, %354, %11 : vector<8x1xi32>
    %cst_75 = arith.constant 0.000000e+00 : f32
    %356 = vector.shape_cast %355 : vector<8x1xi1> to vector<8x1xi1>
    %357 = vector.broadcast %356 : vector<8x1xi1> to vector<8x128xi1>
    %358 = vector.broadcast %cst_75 : f32 to vector<8x128xf32>
    %359 = arith.select %357, %353, %358 : vector<8x128xi1>, vector<8x128xf32>
    %360 = arith.index_cast %322 : i32 to index
    %c0_76 = arith.constant 0 : index
    %361 = vector.load %arg7[%360, %c0_76] : memref<64x128xf32, #tpu.memory_space<vmem>>, vector<8x128xf32>
    tpu.vector_store %arg7[%360, %c0_76], %359 {strides = array<i32>} : memref<64x128xf32, #tpu.memory_space<vmem>>, vector<8x128xf32>,
    %362 = vector.shape_cast %355 : vector<8x1xi1> to vector<8x1xi1>
    %363 = vector.broadcast %362 : vector<8x1xi1> to vector<8x128xi1>
    %364 = arith.select %363, %353, %320 : vector<8x128xi1>, vector<8x128xf32>
    %c8_i32_77 = arith.constant 8 : i32
    return
  }
  func.func @transform_0(%arg0: i32) -> (i32, i32) {
    %c0_i32 = arith.constant 0 : i32
    %c0_i32_0 = arith.constant 0 : i32
    return %arg0, %c0_i32 : i32, i32
  }
  func.func @transform_1(%arg0: i32) -> (i32, i32) {
    %c0_i32 = arith.constant 0 : i32
    %c0_i32_0 = arith.constant 0 : i32
    %c0_i32_1 = arith.constant 0 : i32
    return %c0_i32, %c0_i32_0 : i32, i32
  }
  func.func @transform_2(%arg0: i32) -> (i32, i32) {
    %c0_i32 = arith.constant 0 : i32
    %c0_i32_0 = arith.constant 0 : i32
    %c0_i32_1 = arith.constant 0 : i32
    return %c0_i32, %c0_i32_0 : i32, i32
  }
  func.func @transform_3(%arg0: i32) -> (i32, i32) {
    %c0_i32 = arith.constant 0 : i32
    %c0_i32_0 = arith.constant 0 : i32
    %c0_i32_1 = arith.constant 0 : i32
    return %c0_i32, %c0_i32_0 : i32, i32
  }
  func.func @transform_4(%arg0: i32) -> (i32, i32) {
    %c0_i32 = arith.constant 0 : i32
    %c0_i32_0 = arith.constant 0 : i32
    %c0_i32_1 = arith.constant 0 : i32
    return %c0_i32, %c0_i32_0 : i32, i32
  }
  func.func @transform_5(%arg0: i32) -> (i32, i32) {
    %c0_i32 = arith.constant 0 : i32
    %c0_i32_0 = arith.constant 0 : i32
    return %arg0, %c0_i32 : i32, i32
  }
  func.func @transform_6(%arg0: i32) -> (i32, i32) {
    %c0_i32 = arith.constant 0 : i32
    %c0_i32_0 = arith.constant 0 : i32
    return %arg0, %c0_i32 : i32, i32
  }
}

</mosaic_0001>

<bundles_post_ra>
// kernel: tpu_custom_call.1
= control target key start
LH: loop header
LB: loop body
LE: loop exit
PB: predicated region body
PF: predicated region fallthrough
CT: control target
= control target key end

     0   :  { %11 = vsyncpa [#allocation4], 0  ;;  %s3548_s0 = inlined_call_operand.vmem [shape: f32[64,8], index: 0, kind: input, shape index: {}]   ;;  %s3549_s1 = inlined_call_operand.vmem [shape: f32[8,384], index: 1, kind: input, shape index: {}]   ;;  %s3550_s2 = inlined_call_operand.hbm [shape: f32[128,384], index: 2, kind: input, shape index: {}]   ;;  %s3551_s3 = inlined_call_operand.vmem [shape: f32[1,384], index: 3, kind: input, shape index: {}]   ;;  %s3552_s4 = inlined_call_operand.vmem [shape: f32[1,384], index: 4, kind: input, shape index: {}]   ;;  %s3553_s5 = inlined_call_operand.vmem [shape: s32[8,1], index: 5, kind: input, shape index: {}]   ;;  %s3554_s6 = inlined_call_operand.hbm [shape: f32[64,128], index: 6, kind: output, shape index: {}]  }
   0x1   :  { %12 = vsyncpa [#allocation5], 0  ;;  %s2977_s21 = smov [#allocation3]   ;;  %s2929_s25 = scalar_lea.hbm %s3550_s2, 6144 }
   0x2   :  { %s22_s22 = sshll.u32 %s2977_s21, 4  ;;  %p2930_p0 = scmp.ne.s32.totalorder %s3550_s2, %s2929_s25  ;;  %s23_s22 = int_to_ptr.vmem [resolvable:$true] %s22_s22 }
   0x3   :  { %p2933_p1 = scmp.lt.u32.totalorder %s2929_s25, %s3550_s2 }
   0x5   :  { %p2935_p2 = pnand %p2933_p1, %p2930_p0 }
   0x7   :  { %2938 = shalt.err (!%p2935_p2)
}
   0x8   :  { %s2939_s30 = scalar_lea.vmem %s23_s22, 6144  ;;  %p2944_p4 = scmp.lt.s32.totalorder %s23_s22, %s23_s22 }
   0x9   :  { %p2940_p3 = scmp.ne.s32.totalorder %s23_s22, %s2939_s30  ;;  %p2945_p5 = scmp.lt.s32.totalorder %s2939_s30, %s2939_s30 }
   0xb   :  { %p2946_p6 = por %p2945_p5, %p2944_p4 }
   0xd   :  { %p2947_p7 = pnand %p2946_p6, %p2940_p3 }
   0xf   :  { %2950 = shalt.err (!%p2947_p7)
}
  0x10   :  { %s2978_s7 = smov 384   ;;  %s2979_s8 = smov 24  }
  0x11   :  { %28 = dma.hbm_to_vmem [thread:$0]  %s3550_s2, 6144, %s23_s22, [#allocation4], %s2978_s7, %s2978_s7, %s2979_s8  }
  0x12   :  { %2973 = dma.done.wait [#allocation4], 6144  }
  0x13   :  { %2974 = vsyncadd [#allocation4], 4294961152  ;;  %v2980_v0 = vmov 0.0   ;;  %v2981_v1 = vmov 0   ;;  %v47_v2 = vld [vmem:[%s3549_s1 + $0x8] sm:$0xff]  ;;  %v46_v3 = vld [vmem:[%s3549_s1] sm:$0xff] }
  0x14   :  { %138 = vmatprep.mubr.f32.mxu0 %v2980_v0  ;;  %2847 = vset.pattern.permute.xlu0 %v2981_v1  ;;  %v38_v4 = vld [vmem:[%s3548_s0] sm:$0xff]  ;;  %vm49_vm0 = vcmask 64512   ;;  %v317_v5 = vld [vmem:[#allocation3 + $0x8] sm:$0xff]  ;;  %v319_v9 = vld [vmem:[#allocation3 + $0x18] sm:$0xff]  ;;  %v2982_v41 = vmov 0.0|0.0   ;;  %vm2983_vm3 = vmmov 0  }
  0x15   :  { %2848 = vset.pattern.permute.xlu1 %v2981_v1  ;;  %74 = vmatprep.subr.mxu0 %v47_v2  ;;  %v320_v6 = vld [vmem:[#allocation3 + $0x20] sm:$0xff]  ;;  %v323_v10 = vld [vmem:[#allocation3 + $0x38] sm:$0xff]  ;;  %v326_v12 = vld [vmem:[#allocation3 + $0x50] sm:$0xff] }
  0x16   :  { %v316_v7 = vld [vmem:[#allocation3] sm:$0xff]  ;;  %2049 = vmatprep.mubr.msk.f32.mxu1 %vm49_vm0, %v38_v4  ;;  %75 = vmatpush1.msra.mxu0 %v46_v3  ;;  %v3047_v8 = vpack.c.bf16 %v320_v6, %v317_v5  ;;  %v322_v13 = vld [vmem:[#allocation3 + $0x30] sm:$0xff]  ;;  %v325_v14 = vld [vmem:[#allocation3 + $0x48] sm:$0xff]  ;;  %v3057_v16 = vpack.c.bf16 %v326_v12, %v323_v10 }
  0x17   :  { %1868 = vmatmul.mubr.msk.f32.vlgmr.msra.gmra.mrb[0].mxu0 %vm49_vm0, %v38_v4  ;;  %v3050_v11 = vpack.c.bf16 %v319_v9, %v316_v7  ;;  %v39_v15 = vld [vmem:[%s3548_s0 + $0x8] sm:$0xff]  ;;  %v332_v18 = vld [vmem:[#allocation3 + $0x80] sm:$0xff]  ;;  %v3060_v19 = vpack.c.bf16 %v325_v14, %v322_v13  ;;  %v331_v22 = vld [vmem:[#allocation3 + $0x78] sm:$0xff] }
  0x18   :  { %2342 = vmatprep.subr.bf16.mxu0 %v3047_v8  ;;  %144 = vmatprep.mubr.f32.mxu0 %v2980_v0  ;;  %v329_v17 = vld [vmem:[#allocation3 + $0x68] sm:$0xff]  ;;  %v328_v21 = vld [vmem:[#allocation3 + $0x60] sm:$0xff]  ;;  %v335_v23 = vld [vmem:[#allocation3 + $0x98] sm:$0xff] }
  0x19   :  { %2344 = vmatpush1.bf16.msra.mxu0 %v3050_v11  ;;  %v3063_v20 = vpack.c.bf16 %v332_v18, %v329_v17  ;;  %v338_v24 = vld [vmem:[#allocation3 + $0xb0] sm:$0xff]  ;;  %v3071_v26 = vpack.c.bf16 %v331_v22, %v328_v21  ;;  %v337_v29 = vld [vmem:[#allocation3 + $0xa8] sm:$0xff]  ;;  %v344_v31 = vld [vmem:[#allocation3 + $0xe0] sm:$0xff] }
  0x1a   :  { %2346 = vmatprep.subr.bf16.mxu0 %v3057_v16  ;;  %v40_v25 = vld [vmem:[%s3548_s0 + $0x10] sm:$0xff]  ;;  %v3074_v27 = vpack.c.bf16 %v338_v24, %v335_v23  ;;  %v341_v30 = vld [vmem:[#allocation3 + $0xc8] sm:$0xff]  ;;  %v41_v33 = vld [vmem:[%s3548_s0 + $0x18] sm:$0xff] }
  0x1b   :  { %1869 = vmatmul.mubr.msk.f32.gmra.mrb[2].mxu0 %vm49_vm0, %v39_v15  ;;  %v334_v28 = vld [vmem:[#allocation3 + $0x90] sm:$0xff]  ;;  %v321_v36 = vld [vmem:[#allocation3 + $0x28] sm:$0xff]  ;;  %v3088_v37 = vpack.c.bf16 %v344_v31, %v341_v30  ;;  %v340_v38 = vld [vmem:[#allocation3 + $0xc0] sm:$0xff] }
  0x1c   :  { %150 = vmatprep.mubr.f32.mxu0 %v2980_v0  ;;  %v48_v32 = vld [vmem:[%s3549_s1 + $0x10] sm:$0xff]  ;;  %v3085_v35 = vpack.c.bf16 %v337_v29, %v334_v28  ;;  %v343_v39 = vld [vmem:[#allocation3 + $0xd8] sm:$0xff]  ;;  %v324_v44 = vld [vmem:[#allocation3 + $0x40] sm:$0xff] }
  0x1d   :  { %2348 = vmatpush1.bf16.msra.mxu0 %v3060_v19  ;;  %2047 = vmatprep.subr.mxu1 %v48_v32  ;;  %v318_v34 = vld [vmem:[#allocation3 + $0x10] sm:$0xff]  ;;  %v347_v40 = vld [vmem:[#allocation3 + $0xf8] sm:$0xff]  ;;  %v42_v46 = vld [vmem:[%s3548_s0 + $0x20] sm:$0xff]  ;;  %v3103_v48 = vpack.c.bf16 %v343_v39, %v340_v38  ;;  %v366_v38 = vlaneseq }
  0x1e   :  { %2350 = vmatprep.subr.bf16.mxu0 %v3063_v20  ;;  %2048 = vmatpush3.msra.mxu1 %v48_v32  ;;  %v3091_v42 = vpack.c.bf16 %v321_v36, %v318_v34  ;;  %v350_v43 = vld [vmem:[#allocation3 + $0x110] sm:$0xff]  ;;  %v327_v45 = vld [vmem:[#allocation3 + $0x58] sm:$0xff]  ;;  %v333_v50 = vld [vmem:[#allocation3 + $0x88] sm:$0xff] }
  0x1f   :  { %1870 = vmatmul.mubr.msk.f32.gmra.mrb[4].mxu0 %vm49_vm0, %v40_v25  ;;  %2373 = vmatprep.subr.bf16.mxu1 %v2982_v41  ;;  %v3100_v47 = vpack.c.bf16 %v327_v45, %v324_v44  ;;  %v330_v49 = vld [vmem:[#allocation3 + $0x70] sm:$0xff]  ;;  %v3107_v51 = vpack.c.bf16 %v350_v43, %v347_v40  ;;  %v349_v53 = vld [vmem:[#allocation3 + $0x108] sm:$0xff]  ;;  %v356_v55 = vld [vmem:[#allocation3 + $0x140] sm:$0xff]  ;;  %v367_v39 = vshrl.u32 %v366_v38, 7 }
  0x20   :  { %156 = vmatprep.mubr.f32.mxu0 %v2980_v0  ;;  %2050 = vmatmul.mubr.msk.f32.vlgmr.msra.gmra.mrb[0].mxu1 %vm49_vm0, %v39_v15  ;;  %v346_v52 = vld [vmem:[#allocation3 + $0xf0] sm:$0xff]  ;;  %v353_v54 = vld [vmem:[#allocation3 + $0x128] sm:$0xff]  ;;  %v3117_v57 = vpack.c.bf16 %v333_v50, %v330_v49  ;;  %v336_v59 = vld [vmem:[#allocation3 + $0xa0] sm:$0xff] }
  0x21   :  { %2352 = vmatpush1.bf16.msra.mxu0 %v3071_v26  ;;  %2375 = vmatpush3.bf16.msra.mxu1 %v3091_v42  ;;  %v43_v56 = vld [vmem:[%s3548_s0 + $0x28] sm:$0xff]  ;;  %v3120_v58 = vpack.c.bf16 %v349_v53, %v346_v52  ;;  %v339_v60 = vld [vmem:[#allocation3 + $0xb8] sm:$0xff]  ;;  %v3124_v61 = vpack.c.bf16 %v356_v55, %v353_v54  ;;  %v352_v62 = vld [vmem:[#allocation3 + $0x120] sm:$0xff]  ;;  %v376_v40 = vsub.s32 2, %v367_v39 }
  0x22   :  { %2354 = vmatprep.subr.bf16.mxu0 %v3074_v27  ;;  %2376 = vmatprep.subr.bf16.mxu1 %v2982_v41  ;;  %v355_v63 = vld [vmem:[#allocation3 + $0x138] sm:$0xff]  ;;  %v3130_v2 = vld [vmem:[%s3553_s5] sm:$0xff]  ;;  %v362_v4 = vld [vmem:[#allocation3 + $0x170] sm:$0xff]  ;;  %v3139_v6 = vpack.c.bf16 %v339_v60, %v336_v59  ;;  %v368_v60 = vsub.s32 0, %v367_v39 }
  0x23   :  { %1871 = vmatmul.mubr.msk.f32.gmra.mrb[6].mxu0 %vm49_vm0, %v41_v33  ;;  %2052 = vmatprep.mubr.msk.f32.mxu1 %vm49_vm0, %v40_v25  ;;  %v359_v3 = vld [vmem:[#allocation3 + $0x158] sm:$0xff]  ;;  %v44_v5 = vld [vmem:[%s3548_s0 + $0x30] sm:$0xff]  ;;  %v3142_v7 = vpack.c.bf16 %v355_v63, %v352_v62  ;;  %v345_v10 = vld [vmem:[#allocation3 + $0xe8] sm:$0xff]  ;;  %vm570_vm1 = vcmp.gt.s32.totalorder %v3130_v2, 0  ;;  %vm749_vm2 = vcmp.gt.s32.totalorder %v3130_v2, 1  ;;  %vm1292_vm4 = vcmp.gt.s32.totalorder %v3130_v2, 4 }
  0x24   :  { %162 = vmatprep.mubr.f32.mxu0 %v2980_v0  ;;  %2053 = vmatmul.mubr.msk.f32.gmra.mrb[2].mxu1 %vm49_vm0, %v41_v33  ;;  %v342_v9 = vld [vmem:[#allocation3 + $0xd0] sm:$0xff]  ;;  %v45_v12 = vld [vmem:[%s3548_s0 + $0x38] sm:$0xff]  ;;  %v3150_v13 = vpack.c.bf16 %v362_v4, %v359_v3  ;;  %v361_v15 = vld [vmem:[#allocation3 + $0x168] sm:$0xff]  ;;  %v571_v18 = vsel %vm570_vm1, 1, %v2981_v1  ;;  %v750_v25 = vsel %vm749_vm2, 1, %v2981_v1  ;;  %v1293_v31 = vsel %vm1292_vm4, 1, %v2981_v1 }
  0x25   :  { %2356 = vmatpush1.bf16.msra.mxu0 %v3085_v35  ;;  %2378 = vmatpush3.bf16.msra.mxu1 %v3100_v47  ;;  %v358_v14 = vld [vmem:[#allocation3 + $0x150] sm:$0xff]  ;;  %v3157_v17 = vpack.c.bf16 %v345_v10, %v342_v9  ;;  %v348_v22 = vld [vmem:[#allocation3 + $0x100] sm:$0xff]  ;;  %v351_v23 = vld [vmem:[#allocation3 + $0x118] sm:$0xff]  ;;  %vm1654_vm5 = vcmp.gt.s32.totalorder %v3130_v2, 6  ;;  %v372_v4 = vsub.s32 1, %v367_v39  ;;  %vm930_vm7 = vcmp.gt.s32.totalorder %v3130_v2, 2 }
  0x26   :  { %2358 = vmatprep.subr.bf16.mxu0 %v3088_v37  ;;  %2379 = vmatprep.subr.bf16.mxu1 %v2982_v41  ;;  %v3161_v21 = vpack.c.bf16 %v361_v15, %v358_v14  ;;  %v3171_v24 = vpack.c.bf16 %v351_v23, %v348_v22  ;;  %v354_v28 = vld [vmem:[#allocation3 + $0x130] sm:$0xff]  ;;  %v357_v29 = vld [vmem:[#allocation3 + $0x148] sm:$0xff]  ;;  %v360_v32 = vld [vmem:[#allocation3 + $0x160] sm:$0xff]  ;;  %v1655_v36 = vsel %vm1654_vm5, 1, %v2981_v1  ;;  %vm1111_vm8 = vcmp.gt.s32.totalorder %v3130_v2, 3 }
  0x27   :  { %1872 = vmatmul.mubr.msk.f32.gmra.mrb[8].mxu0 %vm49_vm0, %v42_v46  ;;  %2055 = vmatprep.mubr.msk.f32.mxu1 %vm49_vm0, %v42_v46  ;;  %v3180_v30 = vpack.c.bf16 %v357_v29, %v354_v28  ;;  %v363_v33 = vld [vmem:[#allocation3 + $0x178] sm:$0xff]  ;;  %v364_v43 = vld [vmem:[%s3551_s3] sm:$0x7]  ;;  %vm1473_vm9 = vcmp.gt.s32.totalorder %v3130_v2, 5  ;;  %vm1835_vm10 = vcmp.gt.s32.totalorder %v3130_v2, 7 }
  0x28   :  { %168 = vmatprep.mubr.f32.mxu0 %v2980_v0  ;;  %2056 = vmatmul.mubr.msk.f32.gmra.mrb[4].mxu1 %vm49_vm0, %v43_v56  ;;  %v3189_v34 = vpack.c.bf16 %v363_v33, %v360_v32  ;;  %v377_v44 = vrot.slane %v364_v43, %v376_v40  ;;  %v381_v63 = vld [vmem:[%s3552_s4] sm:$0x7]  ;;  %v369_v10 = vrot.slane %v364_v43, %v368_v60  ;;  %s2984_s4 = smov [#allocation6]  }
  0x29   :  { %2360 = vmatpush1.bf16.msra.mxu0 %v3103_v48  ;;  %2381 = vmatpush3.bf16.msra.mxu1 %v3117_v57  ;;  %v373_v15 = vrot.slane %v364_v43, %v372_v4  ;;  %v3254_v43 = vrot.slane %v381_v63, %v376_v40  ;;  %s1849_s10 = sshll.u32 %s2984_s4, 4  ;;  %s1850_s10 = int_to_ptr.vmem [resolvable:$true] %s1849_s10 }
  0x2a   :  { %2362 = vmatprep.subr.bf16.mxu0 %v3107_v51  ;;  %2382 = vmatprep.subr.bf16.mxu1 %v2982_v41  ;;  %s2951_s11 = scalar_lea.vmem %s1850_s10, 1024  ;;  %p2956_p9 = scmp.lt.s32.totalorder %s1850_s10, %s1850_s10 }
  0x2b   :  { %1873 = vmatmul.mubr.msk.f32.gmra.mrb[10].mxu0 %vm49_vm0, %v43_v56  ;;  %2058 = vmatprep.mubr.msk.f32.mxu1 %vm49_vm0, %v44_v5  ;;  %p2952_p8 = scmp.ne.s32.totalorder %s1850_s10, %s2951_s11  ;;  %p2957_p10 = scmp.lt.s32.totalorder %s2951_s11, %s2951_s11 }
  0x2c   :  { %174 = vmatprep.mubr.f32.mxu0 %v2980_v0  ;;  %2059 = vmatmul.mubr.msk.f32.gmra.mrb[6].mxu1 %vm49_vm0, %v45_v12 }
  0x2d   :  { %2364 = vmatpush1.bf16.msra.mxu0 %v3120_v58  ;;  %2384 = vmatpush3.bf16.msra.mxu1 %v3139_v6  ;;  %p2958_p11 = por %p2957_p10, %p2956_p9 }
  0x2e   :  { %2366 = vmatprep.subr.bf16.mxu0 %v3124_v61  ;;  %2385 = vmatprep.subr.bf16.mxu1 %v2982_v41 }
  0x2f   :  { %1874 = vmatmul.mubr.msk.f32.gmra.mrb[12].mxu0 %vm49_vm0, %v44_v5  ;;  %2093 = vmatprep.mubr.msk.f32.mxu1 %vm2983_vm3, %v2980_v0  ;;  %p2959_p12 = pnand %p2958_p11, %p2952_p8 }
  0x30   :  { %180 = vmatprep.mubr.f32.mxu0 %v2980_v0  ;;  %573 = vperm.xlu0 %2847, %v571_v18   ;;  %v390_v18 = vrot.slane %v381_v63, %v372_v4 }
  0x31   :  { %2368 = vmatpush1.bf16.msra.mxu0 %v3142_v7  ;;  %2387 = vmatpush3.bf16.msra.mxu1 %v3157_v17 }
  0x32   :  { %2370 = vmatprep.subr.bf16.mxu0 %v3150_v13  ;;  %2388 = vmatprep.subr.bf16.mxu1 %v2982_v41 }
  0x33   :  { %1875 = vmatmul.mubr.msk.f32.gmra.mrb[14].mxu0 %vm49_vm0, %v45_v12  ;;  %v386_v12 = vrot.slane %v381_v63, %v368_v60  ;;  %v1474_v63 = vsel %vm1473_vm9, 1, %v2981_v1 }
  0x34   :  { %472 = vmatprep.mubr.f32.mxu0 %v2980_v0  ;;  %752 = vperm.xlu0 %2847, %v750_v25   ;;  %v3250_v25 = vadd.f32 %v390_v18, %v373_v15 }
  0x35   :  { %2372 = vmatpush1.bf16.msra.mxu0 %v3161_v21  ;;  %2390 = vmatpush3.bf16.msra.mxu1 %v3171_v24  ;;  %v3248_v22 = vadd.f32 %v386_v12, %v369_v10 }
  0x36   :  { %2398 = vmatprep.subr.bf16.mxu0 %v3047_v8  ;;  %2391 = vmatprep.subr.bf16.mxu1 %v2982_v41 }
  0x38   :  { %473 = vmatmul.mubr.f32.vlgmr.msra.gmra.mrb[0].mxu0 %v2980_v0  ;;  %1295 = vperm.xlu0 %2847, %v1293_v31  }
  0x39   :  { %2400 = vmatpush1.bf16.msra.mxu0 %v3050_v11  ;;  %651 = vmatprep.mubr.f32.mxu0 %v2980_v0 }
  0x3a   :  { %2402 = vmatprep.subr.bf16.mxu0 %v3057_v16  ;;  %2393 = vmatpush3.bf16.msra.mxu1 %v3180_v30 }
  0x3b   :  { %2394 = vmatprep.subr.bf16.mxu1 %v2982_v41 }
  0x3c   :  { %1657 = vperm.xlu0 %2847, %v1655_v36  }
  0x3d   :  { %2404 = vmatpush1.bf16.msra.mxu0 %v3060_v19 }
  0x3e   :  { %2406 = vmatprep.subr.bf16.mxu0 %v3063_v20  ;;  %2396 = vmatpush3.bf16.msra.mxu1 %v3189_v34 }
  0x3f   :  { %2429 = vmatprep.subr.bf16.mxu1 %v2982_v41 }
  0x41   :  { %2408 = vmatpush1.bf16.msra.mxu0 %v3071_v26  ;;  %2094 = vmatmul.mubr.f32.vlgmr.msra.gmra.mrb[8].mxu1 %v2980_v0 }
  0x42   :  { %2410 = vmatprep.subr.bf16.mxu0 %v3074_v27  ;;  %2431 = vmatpush3.bf16.msra.mxu1 %v3091_v42 }
  0x43   :  { %2128 = vmatprep.mubr.msk.f32.mxu1 %vm2983_vm3, %v2980_v0  ;;  %2432 = vmatprep.subr.bf16.mxu1 %v2982_v41 }
  0x45   :  { %2412 = vmatpush1.bf16.msra.mxu0 %v3085_v35 }
  0x46   :  { %2414 = vmatprep.subr.bf16.mxu0 %v3088_v37  ;;  %2434 = vmatpush3.bf16.msra.mxu1 %v3100_v47 }
  0x47   :  { %2435 = vmatprep.subr.bf16.mxu1 %v2982_v41 }
  0x49   :  { %2416 = vmatpush1.bf16.msra.mxu0 %v3103_v48 }
  0x4a   :  { %2418 = vmatprep.subr.bf16.mxu0 %v3107_v51  ;;  %2437 = vmatpush3.bf16.msra.mxu1 %v3117_v57 }
  0x4b   :  { %2438 = vmatprep.subr.bf16.mxu1 %v2982_v41 }
  0x4d   :  { %2420 = vmatpush1.bf16.msra.mxu0 %v3120_v58 }
  0x4e   :  { %2422 = vmatprep.subr.bf16.mxu0 %v3124_v61  ;;  %2440 = vmatpush3.bf16.msra.mxu1 %v3139_v6 }
  0x4f   :  { %2441 = vmatprep.subr.bf16.mxu1 %v2982_v41 }
  0x51   :  { %2424 = vmatpush1.bf16.msra.mxu0 %v3142_v7 }
  0x52   :  { %2426 = vmatprep.subr.bf16.mxu0 %v3150_v13  ;;  %2443 = vmatpush3.bf16.msra.mxu1 %v3157_v17 }
  0x53   :  { %2444 = vmatprep.subr.bf16.mxu1 %v2982_v41 }
  0x55   :  { %2428 = vmatpush1.bf16.msra.mxu0 %v3161_v21 }
  0x56   :  { %2454 = vmatprep.subr.bf16.mxu0 %v3047_v8  ;;  %2446 = vmatpush3.bf16.msra.mxu1 %v3171_v24 }
  0x57   :  { %2447 = vmatprep.subr.bf16.mxu1 %v2982_v41 }
  0x5a   :  { %2449 = vmatpush3.bf16.msra.mxu1 %v3180_v30 }
  0x5b   :  { %2450 = vmatprep.subr.bf16.mxu1 %v2982_v41 }
  0x5e   :  { %2452 = vmatpush3.bf16.msra.mxu1 %v3189_v34 }
  0x5f   :  { %2485 = vmatprep.subr.bf16.mxu1 %v2982_v41 }
  0xaf   :  { %v574_v15 = vpop.permute.xlu0 %573 }
  0xb0   :  { %vm575_vm6 = vcmp.eq.s32.totalorder %v574_v15, 1 }
  0xf3   :  { %v2051_v45 = vpop.f32.mrb[0].mxu1 }
  0xf4   :  { %v3231_v46 = vadd.f32 %v2051_v45, %v377_v44  ;;  %v253_v49 = vpop.f32.mrb[1].mxu1 }
  0xf5   :  { %v407_v60 = vadd.f32 %v377_v44, %v253_v49  ;;  %v1112_v49 = vsel %vm1111_vm8, 1, %v2981_v1 }
  0xf7   :  { %v2054_v50 = vpop.f32.mrb[2].mxu1 }
  0xf8   :  { %v3233_v52 = vadd.f32 %v2054_v50, %v377_v44  ;;  %v263_v53 = vpop.f32.mrb[3].mxu1 }
  0xf9   :  { %v3235_v54 = vadd.f32 %v377_v44, %v263_v53 }
  0xfb   :  { %v2057_v55 = vpop.f32.mrb[4].mxu1 }
  0xfc   :  { %v3237_v56 = vadd.f32 %v2057_v55, %v377_v44  ;;  %v273_v59 = vpop.f32.mrb[5].mxu1 }
  0xfd   :  { %v3239_v62 = vadd.f32 %v377_v44, %v273_v59 }
  0xff   :  { %v2060_v3 = vpop.f32.mrb[6].mxu1 }
 0x100   :  { %v3244_v5 = vadd.f32 %v2060_v3, %v377_v44  ;;  %v283_v9 = vpop.f32.mrb[7].mxu1 }
 0x101   :  { %v3246_v14 = vadd.f32 %v377_v44, %v283_v9  ;;  %v931_v44 = vsel %vm930_vm7, 1, %v2981_v1 }
 0x102   :  { %933 = vperm.xlu1 %2848, %v931_v44  }
 0x106   :  { %1114 = vperm.xlu1 %2848, %v1112_v49  }
 0x10a   :  { %1476 = vperm.xlu1 %2848, %v1474_v63  }
 0x10b   :  { %v474_v23 = vpop.f32.mrb[0].mxu0 }
 0x10c   :  { %v2790_v28 = vadd.f32 %v3248_v22, %v474_v23  ;;  %v476_v29 = vpop.f32.mrb[1].mxu0 }
 0x10d   :  { %v2792_v32 = vadd.f32 %v3250_v25, %v476_v29  ;;  %v1836_v29 = vsel %vm1835_vm10, 1, %v2981_v1 }
 0x10e   :  { %v1884_v31 = vmul.f32 -1.442695, %v2790_v28  ;;  %1838 = vperm.xlu1 %2848, %v1836_v29  }
 0x10f   :  { %v1885_v33 = vmul.f32 -1.442695, %v2792_v32 }
 0x110   :  { %2849 = vpow2.f32 %v1884_v31 }
 0x111   :  { %2851 = vpow2.f32 %v1885_v33 }
 0x114   :  { %v545_v36 = vpop.f32.mrb[8].mxu1 }
 0x115   :  { %v2095_v38 = vpop.f32.mrb[9].mxu1  ;;  %v546_v55 = vadd.f32 %v545_v36, %v3254_v43 }
 0x11a   :  { %v2850_v39 = vpop.eup %2849 }
 0x11b   :  { %v553_v45 = vadd.f32 1.0, %v2850_v39  ;;  %v2852_v50 = vpop.eup %2851 }
 0x11c   :  { %v560_v53 = vadd.f32 1.0, %v2852_v50 }
 0x11d   :  { %2853 = vrcp.f32 %v553_v45 }
 0x11e   :  { %2855 = vrcp.f32 %v560_v53 }
 0x127   :  { %v2854_v59 = vpop.eup %2853 }
 0x128   :  { %v563_v3 = vmul.f32 %v2854_v59, %v546_v55  ;;  %v2856_v9 = vpop.eup %2855 }
 0x129   :  { %v566_v10 = vsub.f32 1.0, %v2856_v9  ;;  %v568_v23 = vmul.f32 0.0, %v2856_v9 }
 0x12a   :  { %v564_v4 = vadd.f32 %v563_v3, %v407_v60 }
 0x12c   :  { %2857 = vtanh.f32 %v564_v4 }
 0x136   :  { %v2858_v12 = vpop.eup %2857 }
 0x137   :  { %v567_v18 = vmul.f32 %v2858_v12, %v566_v10 }
 0x139   :  { %v569_v28 = vadd.f32 %v568_v23, %v567_v18  ;;  %v753_v23 = vpop.permute.xlu0 %752 }
 0x13a   :  { %vm754_vm11 = vcmp.eq.s32.totalorder %v753_v23, 1 }
 0x13b   :  { %v3257_v40 = vsel %vm575_vm6, %v569_v28, 0.0  ;;  %1886 = vmatmul.mubr.msk.f32.vlgmr.msra.gmra.mrb[2].mxu0 %vm575_vm6, %v569_v28  ;;  %2129 = vmatmul.mubr.msk.f32.vlgmr.msra.gmra.mrb[10].mxu1 %vm575_vm6, %v569_v28 }
 0x13c   :  { %577 = vst [vmem:[#allocation6] sm:$0xff] %v3257_v40  ;;  %2456 = vmatpush1.bf16.msra.mxu0 %v3050_v11  ;;  %2487 = vmatpush3.bf16.msra.mxu1 %v3091_v42 }
 0x13d   :  { %2458 = vmatprep.subr.bf16.mxu0 %v3057_v16  ;;  %2488 = vmatprep.subr.bf16.mxu1 %v2982_v41 }
 0x13e   :  { %832 = vmatprep.mubr.f32.mxu0 %v2980_v0  ;;  %2163 = vmatprep.mubr.msk.f32.mxu1 %vm2983_vm3, %v2980_v0 }
 0x140   :  { %2460 = vmatpush1.bf16.msra.mxu0 %v3060_v19  ;;  %2490 = vmatpush3.bf16.msra.mxu1 %v3100_v47 }
 0x141   :  { %2462 = vmatprep.subr.bf16.mxu0 %v3063_v20  ;;  %2491 = vmatprep.subr.bf16.mxu1 %v2982_v41 }
 0x144   :  { %2464 = vmatpush1.bf16.msra.mxu0 %v3071_v26  ;;  %2493 = vmatpush3.bf16.msra.mxu1 %v3117_v57 }
 0x145   :  { %2466 = vmatprep.subr.bf16.mxu0 %v3074_v27  ;;  %2494 = vmatprep.subr.bf16.mxu1 %v2982_v41 }
 0x148   :  { %2468 = vmatpush1.bf16.msra.mxu0 %v3085_v35  ;;  %2496 = vmatpush3.bf16.msra.mxu1 %v3139_v6 }
 0x149   :  { %2470 = vmatprep.subr.bf16.mxu0 %v3088_v37  ;;  %2497 = vmatprep.subr.bf16.mxu1 %v2982_v41 }
 0x14c   :  { %2472 = vmatpush1.bf16.msra.mxu0 %v3103_v48  ;;  %2499 = vmatpush3.bf16.msra.mxu1 %v3157_v17 }
 0x14d   :  { %2474 = vmatprep.subr.bf16.mxu0 %v3107_v51  ;;  %2500 = vmatprep.subr.bf16.mxu1 %v2982_v41 }
 0x150   :  { %2476 = vmatpush1.bf16.msra.mxu0 %v3120_v58  ;;  %2502 = vmatpush3.bf16.msra.mxu1 %v3171_v24 }
 0x151   :  { %2478 = vmatprep.subr.bf16.mxu0 %v3124_v61  ;;  %2503 = vmatprep.subr.bf16.mxu1 %v2982_v41 }
 0x154   :  { %2480 = vmatpush1.bf16.msra.mxu0 %v3142_v7  ;;  %2505 = vmatpush3.bf16.msra.mxu1 %v3180_v30 }
 0x155   :  { %2482 = vmatprep.subr.bf16.mxu0 %v3150_v13  ;;  %2506 = vmatprep.subr.bf16.mxu1 %v2982_v41 }
 0x158   :  { %2484 = vmatpush1.bf16.msra.mxu0 %v3161_v21  ;;  %2508 = vmatpush3.bf16.msra.mxu1 %v3189_v34 }
 0x159   :  { %2510 = vmatprep.subr.bf16.mxu0 %v3047_v8  ;;  %2541 = vmatprep.subr.bf16.mxu1 %v2982_v41 }
 0x20e   :  { %v653_v31 = vpop.f32.mrb[2].mxu0  ;;  %v724_v32 = vpop.f32.mrb[10].mxu1 }
 0x20f   :  { %v2794_v33 = vadd.f32 %v3248_v22, %v653_v31  ;;  %v655_v36 = vpop.f32.mrb[3].mxu0  ;;  %v2130_v38 = vpop.f32.mrb[11].mxu1  ;;  %v725_v1 = vadd.f32 %v724_v32, %v3254_v43 }
 0x210   :  { %v2796_v45 = vadd.f32 %v3250_v25, %v655_v36 }
 0x211   :  { %v1888_v39 = vmul.f32 -1.442695, %v2794_v33 }
 0x212   :  { %v1889_v50 = vmul.f32 -1.442695, %v2796_v45 }
 0x213   :  { %2859 = vpow2.f32 %v1888_v39 }
 0x214   :  { %2861 = vpow2.f32 %v1889_v50 }
 0x21d   :  { %v2860_v53 = vpop.eup %2859 }
 0x21e   :  { %v732_v55 = vadd.f32 1.0, %v2860_v53  ;;  %v2862_v2 = vpop.eup %2861 }
 0x21f   :  { %v739_v59 = vadd.f32 1.0, %v2862_v2 }
 0x220   :  { %2863 = vrcp.f32 %v732_v55 }
 0x221   :  { %2865 = vrcp.f32 %v739_v59 }
 0x22a   :  { %v2864_v60 = vpop.eup %2863 }
 0x22b   :  { %v742_v3 = vmul.f32 %v2864_v60, %v725_v1  ;;  %v2866_v9 = vpop.eup %2865 }
 0x22c   :  { %v745_v10 = vsub.f32 1.0, %v2866_v9  ;;  %v747_v18 = vmul.f32 %v2866_v9, %v3257_v40 }
 0x22d   :  { %v743_v4 = vadd.f32 %v742_v3, %v3231_v46 }
 0x22f   :  { %2867 = vtanh.f32 %v743_v4  ;;  %v934_v4 = vpop.permute.xlu1 %933 }
 0x230   :  { %vm935_vm12 = vcmp.eq.s32.totalorder %v934_v4, 1 }
 0x239   :  { %v2868_v12 = vpop.eup %2867 }
 0x23a   :  { %v746_v15 = vmul.f32 %v2868_v12, %v745_v10 }
 0x23c   :  { %v748_v28 = vadd.f32 %v747_v18, %v746_v15 }
 0x23e   :  { %v755_v44 = vsel %vm754_vm11, %v748_v28, 0.0  ;;  %v3309_v49 = vsel %vm754_vm11, %v748_v28, %v3257_v40 }
 0x23f   :  { %757 = vst [vmem:[#allocation6 + $0x8] sm:$0xff] %v755_v44  ;;  %833 = vmatmul.mubr.f32.vlgmr.msra.gmra.mrb[4].mxu0 %v3309_v49  ;;  %2164 = vmatmul.mubr.f32.vlgmr.msra.gmra.mrb[12].mxu1 %v3309_v49 }
 0x240   :  { %2512 = vmatpush1.bf16.msra.mxu0 %v3050_v11  ;;  %2543 = vmatpush3.bf16.msra.mxu1 %v3091_v42 }
 0x241   :  { %2514 = vmatprep.subr.bf16.mxu0 %v3057_v16  ;;  %2544 = vmatprep.subr.bf16.mxu1 %v2982_v41 }
 0x242   :  { %1013 = vmatprep.mubr.f32.mxu0 %v2980_v0  ;;  %2198 = vmatprep.mubr.msk.f32.mxu1 %vm2983_vm3, %v2980_v0 }
 0x244   :  { %2516 = vmatpush1.bf16.msra.mxu0 %v3060_v19  ;;  %2546 = vmatpush3.bf16.msra.mxu1 %v3100_v47 }
 0x245   :  { %2518 = vmatprep.subr.bf16.mxu0 %v3063_v20  ;;  %2547 = vmatprep.subr.bf16.mxu1 %v2982_v41 }
 0x248   :  { %2520 = vmatpush1.bf16.msra.mxu0 %v3071_v26  ;;  %2549 = vmatpush3.bf16.msra.mxu1 %v3117_v57 }
 0x249   :  { %2522 = vmatprep.subr.bf16.mxu0 %v3074_v27  ;;  %2550 = vmatprep.subr.bf16.mxu1 %v2982_v41 }
 0x24c   :  { %2524 = vmatpush1.bf16.msra.mxu0 %v3085_v35  ;;  %2552 = vmatpush3.bf16.msra.mxu1 %v3139_v6 }
 0x24d   :  { %2526 = vmatprep.subr.bf16.mxu0 %v3088_v37  ;;  %2553 = vmatprep.subr.bf16.mxu1 %v2982_v41 }
 0x250   :  { %2528 = vmatpush1.bf16.msra.mxu0 %v3103_v48  ;;  %2555 = vmatpush3.bf16.msra.mxu1 %v3157_v17 }
 0x251   :  { %2530 = vmatprep.subr.bf16.mxu0 %v3107_v51  ;;  %2556 = vmatprep.subr.bf16.mxu1 %v2982_v41 }
 0x254   :  { %2532 = vmatpush1.bf16.msra.mxu0 %v3120_v58  ;;  %2558 = vmatpush3.bf16.msra.mxu1 %v3171_v24 }
 0x255   :  { %2534 = vmatprep.subr.bf16.mxu0 %v3124_v61  ;;  %2559 = vmatprep.subr.bf16.mxu1 %v2982_v41 }
 0x258   :  { %2536 = vmatpush1.bf16.msra.mxu0 %v3142_v7  ;;  %2561 = vmatpush3.bf16.msra.mxu1 %v3180_v30 }
 0x259   :  { %2538 = vmatprep.subr.bf16.mxu0 %v3150_v13  ;;  %2562 = vmatprep.subr.bf16.mxu1 %v2982_v41 }
 0x25c   :  { %2540 = vmatpush1.bf16.msra.mxu0 %v3161_v21  ;;  %2564 = vmatpush3.bf16.msra.mxu1 %v3189_v34 }
 0x25d   :  { %2566 = vmatprep.subr.bf16.mxu0 %v3047_v8  ;;  %2597 = vmatprep.subr.bf16.mxu1 %v2982_v41 }
 0x312   :  { %v834_v46 = vpop.f32.mrb[4].mxu0  ;;  %v905_v40 = vpop.f32.mrb[12].mxu1 }
 0x313   :  { %v2798_v63 = vadd.f32 %v3248_v22, %v834_v46  ;;  %v836_v29 = vpop.f32.mrb[5].mxu0  ;;  %v2165_v31 = vpop.f32.mrb[13].mxu1  ;;  %v906_v53 = vadd.f32 %v905_v40, %v3254_v43 }
 0x314   :  { %v2800_v33 = vadd.f32 %v3250_v25, %v836_v29 }
 0x315   :  { %v1890_v32 = vmul.f32 -1.442695, %v2798_v63 }
 0x316   :  { %v1891_v36 = vmul.f32 -1.442695, %v2800_v33 }
 0x317   :  { %2869 = vpow2.f32 %v1890_v32 }
 0x318   :  { %2871 = vpow2.f32 %v1891_v36 }
 0x321   :  { %v2870_v38 = vpop.eup %2869 }
 0x322   :  { %v913_v39 = vadd.f32 1.0, %v2870_v38  ;;  %v2872_v45 = vpop.eup %2871 }
 0x323   :  { %v920_v50 = vadd.f32 1.0, %v2872_v45 }
 0x324   :  { %2873 = vrcp.f32 %v913_v39 }
 0x325   :  { %2875 = vrcp.f32 %v920_v50 }
 0x32e   :  { %v2874_v55 = vpop.eup %2873 }
 0x32f   :  { %v923_v2 = vmul.f32 %v2874_v55, %v906_v53  ;;  %v2876_v1 = vpop.eup %2875 }
 0x330   :  { %v926_v60 = vsub.f32 1.0, %v2876_v1  ;;  %v928_v10 = vmul.f32 %v2876_v1, %v3309_v49  ;;  %v1115_v1 = vpop.permute.xlu1 %1114 }
 0x331   :  { %v924_v59 = vadd.f32 %v923_v2, %v3235_v54  ;;  %vm1116_vm13 = vcmp.eq.s32.totalorder %v1115_v1, 1 }
 0x333   :  { %2877 = vtanh.f32 %v924_v59 }
 0x33d   :  { %v2878_v3 = vpop.eup %2877 }
 0x33e   :  { %v927_v9 = vmul.f32 %v2878_v3, %v926_v60 }
 0x340   :  { %v929_v12 = vadd.f32 %v928_v10, %v927_v9 }
 0x342   :  { %v936_v15 = vsel %vm935_vm12, %v929_v12, 0.0  ;;  %v3354_v18 = vsel %vm935_vm12, %v929_v12, %v3309_v49 }
 0x343   :  { %938 = vst [vmem:[#allocation6 + $0x10] sm:$0xff] %v936_v15  ;;  %1014 = vmatmul.mubr.f32.vlgmr.msra.gmra.mrb[6].mxu0 %v3354_v18  ;;  %2199 = vmatmul.mubr.f32.vlgmr.msra.gmra.mrb[14].mxu1 %v3354_v18 }
 0x344   :  { %2568 = vmatpush1.bf16.msra.mxu0 %v3050_v11  ;;  %2599 = vmatpush3.bf16.msra.mxu1 %v3091_v42 }
 0x345   :  { %2570 = vmatprep.subr.bf16.mxu0 %v3057_v16  ;;  %2600 = vmatprep.subr.bf16.mxu1 %v2982_v41 }
 0x346   :  { %1194 = vmatprep.mubr.f32.mxu0 %v2980_v0  ;;  %2233 = vmatprep.mubr.msk.f32.mxu1 %vm2983_vm3, %v2980_v0 }
 0x348   :  { %2572 = vmatpush1.bf16.msra.mxu0 %v3060_v19  ;;  %2602 = vmatpush3.bf16.msra.mxu1 %v3100_v47 }
 0x349   :  { %2574 = vmatprep.subr.bf16.mxu0 %v3063_v20  ;;  %2603 = vmatprep.subr.bf16.mxu1 %v2982_v41 }
 0x34c   :  { %2576 = vmatpush1.bf16.msra.mxu0 %v3071_v26  ;;  %2605 = vmatpush3.bf16.msra.mxu1 %v3117_v57 }
 0x34d   :  { %2578 = vmatprep.subr.bf16.mxu0 %v3074_v27  ;;  %2606 = vmatprep.subr.bf16.mxu1 %v2982_v41 }
 0x350   :  { %2580 = vmatpush1.bf16.msra.mxu0 %v3085_v35  ;;  %2608 = vmatpush3.bf16.msra.mxu1 %v3139_v6 }
 0x351   :  { %2582 = vmatprep.subr.bf16.mxu0 %v3088_v37  ;;  %2609 = vmatprep.subr.bf16.mxu1 %v2982_v41 }
 0x354   :  { %2584 = vmatpush1.bf16.msra.mxu0 %v3103_v48  ;;  %2611 = vmatpush3.bf16.msra.mxu1 %v3157_v17 }
 0x355   :  { %2586 = vmatprep.subr.bf16.mxu0 %v3107_v51  ;;  %2612 = vmatprep.subr.bf16.mxu1 %v2982_v41 }
 0x358   :  { %2588 = vmatpush1.bf16.msra.mxu0 %v3120_v58  ;;  %2614 = vmatpush3.bf16.msra.mxu1 %v3171_v24 }
 0x359   :  { %2590 = vmatprep.subr.bf16.mxu0 %v3124_v61  ;;  %2615 = vmatprep.subr.bf16.mxu1 %v2982_v41 }
 0x35c   :  { %2592 = vmatpush1.bf16.msra.mxu0 %v3142_v7  ;;  %2617 = vmatpush3.bf16.msra.mxu1 %v3180_v30 }
 0x35d   :  { %2594 = vmatprep.subr.bf16.mxu0 %v3150_v13  ;;  %2618 = vmatprep.subr.bf16.mxu1 %v2982_v41 }
 0x360   :  { %2596 = vmatpush1.bf16.msra.mxu0 %v3161_v21  ;;  %2620 = vmatpush3.bf16.msra.mxu1 %v3189_v34 }
 0x361   :  { %2622 = vmatprep.subr.bf16.mxu0 %v3047_v8  ;;  %2653 = vmatprep.subr.bf16.mxu1 %v2982_v41 }
 0x416   :  { %v1015_v54 = vpop.f32.mrb[6].mxu0  ;;  %v1086_v23 = vpop.f32.mrb[14].mxu1 }
 0x417   :  { %v2802_v28 = vadd.f32 %v3248_v22, %v1015_v54  ;;  %v1017_v44 = vpop.f32.mrb[7].mxu0  ;;  %v2200_v49 = vpop.f32.mrb[15].mxu1  ;;  %v1087_v36 = vadd.f32 %v1086_v23, %v3254_v43 }
 0x418   :  { %v2804_v40 = vadd.f32 %v3250_v25, %v1017_v44 }
 0x419   :  { %v1892_v46 = vmul.f32 -1.442695, %v2802_v28 }
 0x41a   :  { %v1893_v63 = vmul.f32 -1.442695, %v2804_v40 }
 0x41b   :  { %2879 = vpow2.f32 %v1892_v46 }
 0x41c   :  { %2881 = vpow2.f32 %v1893_v63 }
 0x425   :  { %v2880_v29 = vpop.eup %2879 }
 0x426   :  { %v1094_v31 = vadd.f32 1.0, %v2880_v29  ;;  %v2882_v32 = vpop.eup %2881 }
 0x427   :  { %v1101_v33 = vadd.f32 1.0, %v2882_v32 }
 0x428   :  { %2883 = vrcp.f32 %v1094_v31 }
 0x429   :  { %2885 = vrcp.f32 %v1101_v33 }
 0x432   :  { %v2884_v38 = vpop.eup %2883 }
 0x433   :  { %v1104_v39 = vmul.f32 %v2884_v38, %v1087_v36  ;;  %v2886_v50 = vpop.eup %2885 }
 0x434   :  { %v1107_v53 = vsub.f32 1.0, %v2886_v50  ;;  %v1109_v59 = vmul.f32 %v2886_v50, %v3354_v18 }
 0x435   :  { %v1105_v45 = vadd.f32 %v1104_v39, %v3233_v52 }
 0x437   :  { %2887 = vtanh.f32 %v1105_v45  ;;  %v1296_v45 = vpop.permute.xlu0 %1295 }
 0x438   :  { %vm1297_vm14 = vcmp.eq.s32.totalorder %v1296_v45, 1 }
 0x441   :  { %v2888_v55 = vpop.eup %2887 }
 0x442   :  { %v1108_v2 = vmul.f32 %v2888_v55, %v1107_v53 }
 0x444   :  { %v1110_v60 = vadd.f32 %v1109_v59, %v1108_v2 }
 0x446   :  { %v1117_v3 = vsel %vm1116_vm13, %v1110_v60, 0.0  ;;  %v3399_v4 = vsel %vm1116_vm13, %v1110_v60, %v3354_v18 }
 0x447   :  { %1119 = vst [vmem:[#allocation6 + $0x18] sm:$0xff] %v1117_v3  ;;  %1195 = vmatmul.mubr.f32.vlgmr.msra.gmra.mrb[8].mxu0 %v3399_v4  ;;  %2234 = vmatmul.mubr.f32.vlgmr.msra.gmra.mrb[16].mxu1 %v3399_v4 }
 0x448   :  { %2624 = vmatpush1.bf16.msra.mxu0 %v3050_v11  ;;  %2655 = vmatpush3.bf16.msra.mxu1 %v3091_v42 }
 0x449   :  { %2626 = vmatprep.subr.bf16.mxu0 %v3057_v16  ;;  %2656 = vmatprep.subr.bf16.mxu1 %v2982_v41 }
 0x44a   :  { %1375 = vmatprep.mubr.f32.mxu0 %v2980_v0  ;;  %2268 = vmatprep.mubr.msk.f32.mxu1 %vm2983_vm3, %v2980_v0 }
 0x44c   :  { %2628 = vmatpush1.bf16.msra.mxu0 %v3060_v19  ;;  %2658 = vmatpush3.bf16.msra.mxu1 %v3100_v47 }
 0x44d   :  { %2630 = vmatprep.subr.bf16.mxu0 %v3063_v20  ;;  %2659 = vmatprep.subr.bf16.mxu1 %v2982_v41 }
 0x450   :  { %2632 = vmatpush1.bf16.msra.mxu0 %v3071_v26  ;;  %2661 = vmatpush3.bf16.msra.mxu1 %v3117_v57 }
 0x451   :  { %2634 = vmatprep.subr.bf16.mxu0 %v3074_v27  ;;  %2662 = vmatprep.subr.bf16.mxu1 %v2982_v41 }
 0x454   :  { %2636 = vmatpush1.bf16.msra.mxu0 %v3085_v35  ;;  %2664 = vmatpush3.bf16.msra.mxu1 %v3139_v6 }
 0x455   :  { %2638 = vmatprep.subr.bf16.mxu0 %v3088_v37  ;;  %2665 = vmatprep.subr.bf16.mxu1 %v2982_v41 }
 0x458   :  { %2640 = vmatpush1.bf16.msra.mxu0 %v3103_v48  ;;  %2667 = vmatpush3.bf16.msra.mxu1 %v3157_v17 }
 0x459   :  { %2642 = vmatprep.subr.bf16.mxu0 %v3107_v51  ;;  %2668 = vmatprep.subr.bf16.mxu1 %v2982_v41 }
 0x45c   :  { %2644 = vmatpush1.bf16.msra.mxu0 %v3120_v58  ;;  %2670 = vmatpush3.bf16.msra.mxu1 %v3171_v24 }
 0x45d   :  { %2646 = vmatprep.subr.bf16.mxu0 %v3124_v61  ;;  %2671 = vmatprep.subr.bf16.mxu1 %v2982_v41 }
 0x460   :  { %2648 = vmatpush1.bf16.msra.mxu0 %v3142_v7  ;;  %2673 = vmatpush3.bf16.msra.mxu1 %v3180_v30 }
 0x461   :  { %2650 = vmatprep.subr.bf16.mxu0 %v3150_v13  ;;  %2674 = vmatprep.subr.bf16.mxu1 %v2982_v41 }
 0x464   :  { %2652 = vmatpush1.bf16.msra.mxu0 %v3161_v21  ;;  %2676 = vmatpush3.bf16.msra.mxu1 %v3189_v34 }
 0x465   :  { %2678 = vmatprep.subr.bf16.mxu0 %v3047_v8  ;;  %2709 = vmatprep.subr.bf16.mxu1 %v2982_v41 }
 0x51a   :  { %v1196_v52 = vpop.f32.mrb[8].mxu0  ;;  %v1267_v9 = vpop.f32.mrb[16].mxu1 }
 0x51b   :  { %v2806_v10 = vadd.f32 %v3248_v22, %v1196_v52  ;;  %v1198_v12 = vpop.f32.mrb[9].mxu0  ;;  %v2235_v15 = vpop.f32.mrb[17].mxu1  ;;  %v1268_v40 = vadd.f32 %v1267_v9, %v3254_v43 }
 0x51c   :  { %v2808_v54 = vadd.f32 %v3250_v25, %v1198_v12 }
 0x51d   :  { %v1894_v18 = vmul.f32 -1.442695, %v2806_v10 }
 0x51e   :  { %v1895_v23 = vmul.f32 -1.442695, %v2808_v54 }
 0x51f   :  { %2889 = vpow2.f32 %v1894_v18 }
 0x520   :  { %2891 = vpow2.f32 %v1895_v23 }
 0x529   :  { %v2890_v28 = vpop.eup %2889 }
 0x52a   :  { %v1275_v44 = vadd.f32 1.0, %v2890_v28  ;;  %v2892_v49 = vpop.eup %2891 }
 0x52b   :  { %v1282_v46 = vadd.f32 1.0, %v2892_v49 }
 0x52c   :  { %2893 = vrcp.f32 %v1275_v44 }
 0x52d   :  { %2895 = vrcp.f32 %v1282_v46 }
 0x536   :  { %v2894_v63 = vpop.eup %2893 }
 0x537   :  { %v1285_v29 = vmul.f32 %v2894_v63, %v1268_v40  ;;  %v2896_v32 = vpop.eup %2895  ;;  %v1477_v63 = vpop.permute.xlu1 %1476 }
 0x538   :  { %v1288_v33 = vsub.f32 1.0, %v2896_v32  ;;  %v1290_v39 = vmul.f32 %v2896_v32, %v3399_v4  ;;  %vm1478_vm15 = vcmp.eq.s32.totalorder %v1477_v63, 1 }
 0x539   :  { %v1286_v31 = vadd.f32 %v1285_v29, %v3239_v62 }
 0x53b   :  { %2897 = vtanh.f32 %v1286_v31 }
 0x545   :  { %v2898_v36 = vpop.eup %2897 }
 0x546   :  { %v1289_v38 = vmul.f32 %v2898_v36, %v1288_v33 }
 0x548   :  { %v1291_v50 = vadd.f32 %v1290_v39, %v1289_v38 }
 0x54a   :  { %v1298_v53 = vsel %vm1297_vm14, %v1291_v50, 0.0  ;;  %v3444_v55 = vsel %vm1297_vm14, %v1291_v50, %v3399_v4 }
 0x54b   :  { %1300 = vst [vmem:[#allocation6 + $0x20] sm:$0xff] %v1298_v53  ;;  %1376 = vmatmul.mubr.f32.vlgmr.msra.gmra.mrb[10].mxu0 %v3444_v55  ;;  %2269 = vmatmul.mubr.f32.vlgmr.msra.gmra.mrb[18].mxu1 %v3444_v55 }
 0x54c   :  { %2680 = vmatpush1.bf16.msra.mxu0 %v3050_v11  ;;  %2711 = vmatpush3.bf16.msra.mxu1 %v3091_v42 }
 0x54d   :  { %2682 = vmatprep.subr.bf16.mxu0 %v3057_v16  ;;  %2712 = vmatprep.subr.bf16.mxu1 %v2982_v41 }
 0x54e   :  { %1556 = vmatprep.mubr.f32.mxu0 %v2980_v0  ;;  %2303 = vmatprep.mubr.msk.f32.mxu1 %vm2983_vm3, %v2980_v0 }
 0x550   :  { %2684 = vmatpush1.bf16.msra.mxu0 %v3060_v19  ;;  %2714 = vmatpush3.bf16.msra.mxu1 %v3100_v47 }
 0x551   :  { %2686 = vmatprep.subr.bf16.mxu0 %v3063_v20  ;;  %2715 = vmatprep.subr.bf16.mxu1 %v2982_v41 }
 0x554   :  { %2688 = vmatpush1.bf16.msra.mxu0 %v3071_v26  ;;  %2717 = vmatpush3.bf16.msra.mxu1 %v3117_v57 }
 0x555   :  { %2690 = vmatprep.subr.bf16.mxu0 %v3074_v27  ;;  %2718 = vmatprep.subr.bf16.mxu1 %v2982_v41 }
 0x558   :  { %2692 = vmatpush1.bf16.msra.mxu0 %v3085_v35  ;;  %2720 = vmatpush3.bf16.msra.mxu1 %v3139_v6 }
 0x559   :  { %2694 = vmatprep.subr.bf16.mxu0 %v3088_v37  ;;  %2721 = vmatprep.subr.bf16.mxu1 %v2982_v41 }
 0x55c   :  { %2696 = vmatpush1.bf16.msra.mxu0 %v3103_v48  ;;  %2723 = vmatpush3.bf16.msra.mxu1 %v3157_v17 }
 0x55d   :  { %2698 = vmatprep.subr.bf16.mxu0 %v3107_v51  ;;  %2724 = vmatprep.subr.bf16.mxu1 %v2982_v41 }
 0x560   :  { %2700 = vmatpush1.bf16.msra.mxu0 %v3120_v58  ;;  %2726 = vmatpush3.bf16.msra.mxu1 %v3171_v24 }
 0x561   :  { %2702 = vmatprep.subr.bf16.mxu0 %v3124_v61  ;;  %2727 = vmatprep.subr.bf16.mxu1 %v2982_v41 }
 0x564   :  { %2704 = vmatpush1.bf16.msra.mxu0 %v3142_v7  ;;  %2729 = vmatpush3.bf16.msra.mxu1 %v3180_v30 }
 0x565   :  { %2706 = vmatprep.subr.bf16.mxu0 %v3150_v13  ;;  %2730 = vmatprep.subr.bf16.mxu1 %v2982_v41 }
 0x568   :  { %2708 = vmatpush1.bf16.msra.mxu0 %v3161_v21  ;;  %2732 = vmatpush3.bf16.msra.mxu1 %v3189_v34 }
 0x569   :  { %2734 = vmatprep.subr.bf16.mxu0 %v3047_v8  ;;  %2765 = vmatprep.subr.bf16.mxu1 %v2982_v41 }
 0x61e   :  { %v1377_v62 = vpop.f32.mrb[10].mxu0  ;;  %v1448_v2 = vpop.f32.mrb[18].mxu1 }
 0x61f   :  { %v2810_v59 = vadd.f32 %v3248_v22, %v1377_v62  ;;  %v1379_v1 = vpop.f32.mrb[11].mxu0  ;;  %v2270_v60 = vpop.f32.mrb[19].mxu1  ;;  %v1449_v8 = vadd.f32 %v1448_v2, %v3254_v43 }
 0x620   :  { %v2812_v4 = vadd.f32 %v3250_v25, %v1379_v1 }
 0x621   :  { %v1896_v3 = vmul.f32 -1.442695, %v2810_v59 }
 0x622   :  { %v1897_v52 = vmul.f32 -1.442695, %v2812_v4 }
 0x623   :  { %2899 = vpow2.f32 %v1896_v3 }
 0x624   :  { %2901 = vpow2.f32 %v1897_v52 }
 0x62d   :  { %v2900_v9 = vpop.eup %2899 }
 0x62e   :  { %v1456_v10 = vadd.f32 1.0, %v2900_v9  ;;  %v2902_v12 = vpop.eup %2901 }
 0x62f   :  { %v1463_v15 = vadd.f32 1.0, %v2902_v12 }
 0x630   :  { %2903 = vrcp.f32 %v1456_v10 }
 0x631   :  { %2905 = vrcp.f32 %v1463_v15 }
 0x63a   :  { %v2904_v18 = vpop.eup %2903 }
 0x63b   :  { %v1466_v54 = vmul.f32 %v2904_v18, %v1449_v8  ;;  %v2906_v28 = vpop.eup %2905 }
 0x63c   :  { %v1469_v44 = vsub.f32 1.0, %v2906_v28  ;;  %v1471_v40 = vmul.f32 %v2906_v28, %v3444_v55 }
 0x63d   :  { %v1467_v23 = vadd.f32 %v1466_v54, %v3237_v56 }
 0x63f   :  { %2907 = vtanh.f32 %v1467_v23 }
 0x649   :  { %v2908_v49 = vpop.eup %2907 }
 0x64a   :  { %v1470_v46 = vmul.f32 %v2908_v49, %v1469_v44 }
 0x64c   :  { %v1472_v29 = vadd.f32 %v1471_v40, %v1470_v46 }
 0x64e   :  { %v1479_v31 = vsel %vm1478_vm15, %v1472_v29, 0.0  ;;  %v3489_v32 = vsel %vm1478_vm15, %v1472_v29, %v3444_v55 }
 0x64f   :  { %1481 = vst [vmem:[#allocation6 + $0x28] sm:$0xff] %v1479_v31  ;;  %1557 = vmatmul.mubr.f32.vlgmr.msra.gmra.mrb[12].mxu0 %v3489_v32  ;;  %2304 = vmatmul.mubr.f32.vlgmr.msra.gmra.mrb[20].mxu1 %v3489_v32 }
 0x650   :  { %2736 = vmatpush1.bf16.msra.mxu0 %v3050_v11  ;;  %2767 = vmatpush3.bf16.msra.mxu1 %v3091_v42 }
 0x651   :  { %2738 = vmatprep.subr.bf16.mxu0 %v3057_v16  ;;  %2768 = vmatprep.subr.bf16.mxu1 %v2982_v41 }
 0x652   :  { %1737 = vmatprep.mubr.f32.mxu0 %v2980_v0  ;;  %2338 = vmatprep.mubr.msk.f32.mxu1 %vm2983_vm3, %v2980_v0 }
 0x654   :  { %2740 = vmatpush1.bf16.msra.mxu0 %v3060_v19  ;;  %2770 = vmatpush3.bf16.msra.mxu1 %v3100_v47 }
 0x655   :  { %2742 = vmatprep.subr.bf16.mxu0 %v3063_v20  ;;  %2771 = vmatprep.subr.bf16.mxu1 %v2982_v41 }
 0x658   :  { %2744 = vmatpush1.bf16.msra.mxu0 %v3071_v26  ;;  %2773 = vmatpush3.bf16.msra.mxu1 %v3117_v57 }
 0x659   :  { %2746 = vmatprep.subr.bf16.mxu0 %v3074_v27  ;;  %2774 = vmatprep.subr.bf16.mxu1 %v2982_v41 }
 0x65c   :  { %2748 = vmatpush1.bf16.msra.mxu0 %v3085_v35  ;;  %2776 = vmatpush3.bf16.msra.mxu1 %v3139_v6 }
 0x65d   :  { %2750 = vmatprep.subr.bf16.mxu0 %v3088_v37  ;;  %2777 = vmatprep.subr.bf16.mxu1 %v2982_v41 }
 0x660   :  { %2752 = vmatpush1.bf16.msra.mxu0 %v3103_v48  ;;  %2779 = vmatpush3.bf16.msra.mxu1 %v3157_v17 }
 0x661   :  { %2754 = vmatprep.subr.bf16.mxu0 %v3107_v51  ;;  %2780 = vmatprep.subr.bf16.mxu1 %v2982_v41 }
 0x664   :  { %2756 = vmatpush1.bf16.msra.mxu0 %v3120_v58  ;;  %2782 = vmatpush3.bf16.msra.mxu1 %v3171_v24 }
 0x665   :  { %2758 = vmatprep.subr.bf16.mxu0 %v3124_v61  ;;  %2783 = vmatprep.subr.bf16.mxu1 %v2982_v41 }
 0x668   :  { %2760 = vmatpush1.bf16.msra.mxu0 %v3142_v7  ;;  %2785 = vmatpush3.bf16.msra.mxu1 %v3180_v30 }
 0x669   :  { %2762 = vmatprep.subr.bf16.mxu0 %v3150_v13  ;;  %2786 = vmatprep.subr.bf16.mxu1 %v2982_v41  ;;  %v1658_v13 = vpop.permute.xlu0 %1657 }
 0x66a   :  { %vm1659_vm0 = vcmp.eq.s32.totalorder %v1658_v13, 1 }
 0x66c   :  { %2764 = vmatpush1.bf16.msra.mxu0 %v3161_v21  ;;  %2788 = vmatpush3.bf16.msra.mxu1 %v3189_v34 }
 0x722   :  { %v1558_v0 = vpop.f32.mrb[12].mxu0  ;;  %v1629_v11 = vpop.f32.mrb[20].mxu1 }
 0x723   :  { %v2814_v16 = vadd.f32 %v3248_v22, %v1558_v0  ;;  %v1560_v19 = vpop.f32.mrb[13].mxu0  ;;  %v2305_v20 = vpop.f32.mrb[21].mxu1  ;;  %v1630_v48 = vadd.f32 %v1629_v11, %v3254_v43 }
 0x724   :  { %v2816_v27 = vadd.f32 %v3250_v25, %v1560_v19 }
 0x725   :  { %v1898_v26 = vmul.f32 -1.442695, %v2814_v16 }
 0x726   :  { %v1899_v35 = vmul.f32 -1.442695, %v2816_v27 }
 0x727   :  { %2909 = vpow2.f32 %v1898_v26 }
 0x728   :  { %2911 = vpow2.f32 %v1899_v35 }
 0x731   :  { %v2910_v37 = vpop.eup %2909 }
 0x732   :  { %v1637_v42 = vadd.f32 1.0, %v2910_v37  ;;  %v2912_v41 = vpop.eup %2911 }
 0x733   :  { %v1644_v47 = vadd.f32 1.0, %v2912_v41 }
 0x734   :  { %2913 = vrcp.f32 %v1637_v42 }
 0x735   :  { %2915 = vrcp.f32 %v1644_v47 }
 0x73e   :  { %v2914_v51 = vpop.eup %2913 }
 0x73f   :  { %v1647_v57 = vmul.f32 %v2914_v51, %v1630_v48  ;;  %v2916_v61 = vpop.eup %2915 }
 0x740   :  { %v1650_v6 = vsub.f32 1.0, %v2916_v61  ;;  %v1652_v21 = vmul.f32 %v2916_v61, %v3489_v32 }
 0x741   :  { %v1648_v58 = vadd.f32 %v1647_v57, %v3246_v14 }
 0x743   :  { %2917 = vtanh.f32 %v1648_v58 }
 0x74d   :  { %v2918_v7 = vpop.eup %2917 }
 0x74e   :  { %v1651_v17 = vmul.f32 %v2918_v7, %v1650_v6 }
 0x750   :  { %v1653_v24 = vadd.f32 %v1652_v21, %v1651_v17 }
 0x752   :  { %v1660_v30 = vsel %vm1659_vm0, %v1653_v24, 0.0  ;;  %v1663_v34 = vsel %vm1659_vm0, %v1653_v24, %v3489_v32 }
 0x753   :  { %1662 = vst [vmem:[#allocation6 + $0x30] sm:$0xff] %v1660_v30  ;;  %1738 = vmatmul.mubr.f32.vlgmr.msra.gmra.mrb[14].mxu0 %v1663_v34  ;;  %2339 = vmatmul.mubr.f32.vlgmr.msra.gmra.mrb[22].mxu1 %v1663_v34 }
 0x826   :  { %v1739_v56 = vpop.f32.mrb[14].mxu0  ;;  %v1810_v33 = vpop.f32.mrb[22].mxu1 }
 0x827   :  { %v2818_v14 = vadd.f32 %v3248_v22, %v1739_v56  ;;  %v1741_v36 = vpop.f32.mrb[15].mxu0  ;;  %v2340_v38 = vpop.f32.mrb[23].mxu1  ;;  %v1811_v59 = vadd.f32 %v1810_v33, %v3254_v43 }
 0x828   :  { %v2820_v45 = vadd.f32 %v3250_v25, %v1741_v36  ;;  %v1839_v25 = vpop.permute.xlu1 %1838 }
 0x829   :  { %v1900_v39 = vmul.f32 -1.442695, %v2818_v14  ;;  %vm1840_vm1 = vcmp.eq.s32.totalorder %v1839_v25, 1 }
 0x82a   :  { %v1901_v50 = vmul.f32 -1.442695, %v2820_v45 }
 0x82b   :  { %2919 = vpow2.f32 %v1900_v39 }
 0x82c   :  { %2921 = vpow2.f32 %v1901_v50 }
 0x835   :  { %v2920_v53 = vpop.eup %2919 }
 0x836   :  { %v1818_v55 = vadd.f32 1.0, %v2920_v53  ;;  %v2922_v62 = vpop.eup %2921 }
 0x837   :  { %v1825_v2 = vadd.f32 1.0, %v2922_v62 }
 0x838   :  { %2923 = vrcp.f32 %v1818_v55 }
 0x839   :  { %2925 = vrcp.f32 %v1825_v2 }
 0x842   :  { %v2924_v1 = vpop.eup %2923 }
 0x843   :  { %v1828_v60 = vmul.f32 %v2924_v1, %v1811_v59  ;;  %v2926_v3 = vpop.eup %2925 }
 0x844   :  { %v1831_v4 = vsub.f32 1.0, %v2926_v3  ;;  %v1833_v10 = vmul.f32 %v2926_v3, %v1663_v34 }
 0x845   :  { %v1829_v22 = vadd.f32 %v1828_v60, %v3244_v5 }
 0x847   :  { %2927 = vtanh.f32 %v1829_v22 }
 0x851   :  { %v2928_v52 = vpop.eup %2927 }
 0x852   :  { %v1832_v9 = vmul.f32 %v2928_v52, %v1831_v4 }
 0x854   :  { %v1834_v12 = vadd.f32 %v1833_v10, %v1832_v9 }
 0x856   :  { %v1841_v15 = vsel %vm1840_vm1, %v1834_v12, 0.0 }
 0x857   :  { %1843 = vst [vmem:[#allocation6 + $0x38] sm:$0xff] %v1841_v15 }
 0x858   :  { %2962 = shalt.err (!%p2959_p12)
}
 0x859   :  { %s2963_s14 = scalar_lea.hbm %s3554_s6, 1024 }
 0x85a   :  { %p2964_p13 = scmp.ne.s32.totalorder %s3554_s6, %s2963_s14  ;;  %p2967_p0 = scmp.lt.u32.totalorder %s2963_s14, %s3554_s6 }
 0x85c   :  { %p2969_p1 = pnand %p2967_p0, %p2964_p13 }
 0x85e   :  { %2972 = shalt.err (!%p2969_p1)
}
 0x85f   :  { %s2985_s18 = smov 128   ;;  %s2986_s19 = smov 8  }
 0x860   :  { %1855 = dma.vmem_to_hbm [thread:$0]  %s1850_s10, 1024, %s3554_s6, [#allocation5], %s2985_s18, %s2985_s18, %s2986_s19  }
 0x861   :  { %2975 = dma.done.wait [#allocation5], 1024  }
 0x862   :  { %2976 = vsyncadd [#allocation5], 4294966272 }
 0x863   :  { %1859 = vsyncpa [#allocation4], 1 }
 0x864   :  { %1860 = vsyncpa [#allocation5], 1 }

</bundles_post_ra>
